<compile_context>
chip_gen: v5e
topology: v5e:2x2
jax: 0.10.0
libtpu: 0.0.40
codegen_flags: <defaults>
</compile_context>

<pallas_src>
import jax
import jax.numpy as jnp
from jax import lax
from jax.experimental import pallas as pl
from jax.experimental.pallas import tpu as pltpu

EXPANSION = 4


def _vmem_limit_bytes():
    """Generation-aware scoped-VMEM limit: ~half of physical, capped at 48 MiB."""
    cap = None
    try:
        cap = pltpu.get_tpu_info().vmem_capacity_bytes
    except Exception:
        cap = None
    if not cap:
        cap = 128 * 1024 * 1024
    return int(min(cap // 2, 48 * 1024 * 1024))


def _make_kernel(H, W, Cin, P, Pe, stride, has_proj):
    """Builds the fused bottleneck kernel body (one image per grid step)."""
    Ho, Wo = H // stride, W // stride
    fuse = has_proj and stride == 1          # conv1 + projection share one MXU pass

    def kernel(*refs):
        it = iter(refs)
        x_ref = next(it)                                   # (H, W, Cin) bf16
        s1_ref, b1_ref = next(it), next(it)                # (1, Cin) f32
        w1_ref = next(it)                                  # (Cin, P) or (Cin, Pe+P) bf16
        s2_ref, b2_ref = next(it), next(it)                # (1, P) f32
        w2_ref = next(it)                                  # (3, 3P, P) bf16
        s3_ref, b3_ref = next(it), next(it)                # (1, P) f32
        w3_ref = next(it)                                  # (P, Pe) bf16
        wsc_ref = next(it) if (has_proj and stride != 1) else None
        o_ref = next(it)                                   # (Ho*Wo, Pe) bf16
        pad_ref = next(it)                                 # (H+2, W, 3P) bf16 scratch
        pdt = pad_ref.dtype

        # ---- bn1 + relu (folded inference affine), f32 compute ---------------
        a1 = jnp.maximum(x_ref[...].astype(jnp.float32) * s1_ref[...] + b1_ref[...], 0.0)
        a1b = a1.reshape(H * W, Cin).astype(jnp.bfloat16)

        if has_proj and stride != 1:
            # TODO(synk): stride != 1 path is not exercised by the smoke test.
            a1sub_b = a1[::stride, ::stride, :].reshape(Ho * Wo, Cin).astype(jnp.bfloat16)

        # ---- conv1 (1x1), fused with the projection shortcut when possible ----
        if fuse:
            # w1_ref holds [wsc | w1]; Pe is 128-aligned for planes % 32 == 0 so
            # both column slices are lane-aligned.
            big = jnp.dot(a1b, w1_ref[...], preferred_element_type=jnp.float32)
            sc = big[:, :Pe]                    # projection shortcut (H*W, Pe) f32
            out1 = big[:, Pe:]                  # conv1 output        (H*W, P)  f32
        else:
            out1 = jnp.dot(a1b, w1_ref[...], preferred_element_type=jnp.float32)

        # ---- bn2 + relu --------------------------------------------------------
        a2b = jnp.maximum(out1 * s2_ref[...] + b2_ref[...], 0.0
                          ).astype(jnp.bfloat16).reshape(H, W, P)

        # ---- conv2 (3x3, pad=1): kw-im2col scratch via direct sub-stores -------
        # Scratch row h+1, col w, lanes [j*P:(j+1)*P] hold a2[h, w+j-1] (j=0,1,2).
        zc = jnp.zeros((H, 1, P), pdt)
        zr = jnp.zeros((1, W, 3 * P), pdt)
        pad_ref[1:H + 1, :, P:2 * P] = a2b                        # center: a2[h, w]
        pad_ref[1:H + 1, 1:W, 0:P] = a2b[:, :W - 1, :]            # left:   a2[h, w-1]
        pad_ref[1:H + 1, 0:1, 0:P] = zc
        pad_ref[1:H + 1, 0:W - 1, 2 * P:3 * P] = a2b[:, 1:, :]    # right:  a2[h, w+1]
        pad_ref[1:H + 1, W - 1:W, 2 * P:3 * P] = zc
        # Halo rows re-zeroed every step (scratch persists across grid steps and
        # the batch axis is "parallel"-sharded; gating on program_id would be wrong).
        pad_ref[0:1, :, :] = zr
        pad_ref[H + 1:H + 2, :, :] = zr

        # One (H*W, 3P) @ (3P, P) matmul per kh tap; first tap seeds the accumulator.
        acc = jnp.dot(pad_ref[0:H, :, :].reshape(H * W, 3 * P), w2_ref[0],
                      preferred_element_type=jnp.float32)
        for kh in (1, 2):
            acc = acc + jnp.dot(pad_ref[kh:kh + H, :, :].reshape(H * W, 3 * P),
                                w2_ref[kh], preferred_element_type=jnp.float32)
        if stride != 1:
            # For k=3, pad=1: stride-s conv == stride-1 conv subsampled at ::s.
            # TODO(synk): stride != 1 path is not exercised by the smoke test.
            acc = acc.reshape(H, W, P)[::stride, ::stride, :].reshape(Ho * Wo, P)

        # ---- bn3 + relu + conv3 (1x1) ------------------------------------------
        a3b = jnp.maximum(acc * s3_ref[...] + b3_ref[...], 0.0).astype(jnp.bfloat16)
        out3 = jnp.dot(a3b, w3_ref[...], preferred_element_type=jnp.float32)

        # ---- shortcut + residual add -------------------------------------------
        # Per this module, the shortcut consumes relu(bn1(x)) (== a1), not raw x.
        if not has_proj:
            # Identity: recompute from the resident input block instead of keeping
            # a (H*W, Cin) f32 value live across conv2/conv3.
            sc = jnp.maximum(x_ref[...].astype(jnp.float32) * s1_ref[...] + b1_ref[...],
                             0.0).reshape(Ho * Wo, Pe)
        elif stride != 1:
            sc = jnp.dot(a1sub_b, wsc_ref[...], preferred_element_type=jnp.float32)
        o_ref[...] = (out3 + sc).astype(o_ref.dtype)

    return kernel


def preact_bottleneck(x_nchw, p, stride=1):
    """Forward pass of PreActBottleneck.  x_nchw: (N, Cin, H, W) like PyTorch."""
    N, Cin, H, W = x_nchw.shape
    P = p['w1'].shape[1]
    Pe = p['w3'].shape[1]
    assert H % stride == 0 and W % stride == 0
    Ho, Wo = H // stride, W // stride
    has_proj = 'wsc' in p
    assert has_proj or (stride == 1 and Cin == Pe)

    # One fused transpose + cast pass: NCHW f32 -> NHWC bf16 (channels on lanes).
    # TODO(synk): in a full network keep activations NHWC/bf16 across blocks and
    # transpose only at model edges; this NCHW round-trip is interface parity only.
    x = jnp.transpose(x_nchw, (0, 2, 3, 1)).astype(jnp.bfloat16)

    fuse = has_proj and stride == 1
    params = dict(p)
    if fuse:
        # conv1 and the projection shortcut share the same LHS -> one MXU pass.
        params['w1sc'] = jnp.concatenate([p['wsc'], p['w1']], axis=1)   # (Cin, Pe+P) bf16

    inputs = [x]
    in_specs = [pl.BlockSpec((None, H, W, Cin), lambda n: (n, 0, 0, 0))]

    def full(a):   # whole (small) parameter array as one resident block
        return pl.BlockSpec(a.shape, lambda n, _nd=a.ndim: (0,) * _nd)

    names = ['s1', 'b1', 'w1sc' if fuse else 'w1',
             's2', 'b2', 'w2', 's3', 'b3', 'w3']
    if has_proj and stride != 1:
        names.append('wsc')
    for name in names:
        inputs.append(params[name])
        in_specs.append(full(params[name]))

    out = pl.pallas_call(
        _make_kernel(H, W, Cin, P, Pe, stride, has_proj),
        out_shape=jax.ShapeDtypeStruct((N, Ho * Wo, Pe), jnp.bfloat16),
        grid=(N,),
        in_specs=in_specs,
        out_specs=pl.BlockSpec((None, Ho * Wo, Pe), lambda n: (n, 0, 0)),
        scratch_shapes=[pltpu.VMEM((H + 2, W, 3 * P), jnp.bfloat16)],
        compiler_params=pltpu.CompilerParams(
            dimension_semantics=("parallel",),          # images are independent
            vmem_limit_bytes=_vmem_limit_bytes()),
    )(*inputs)

    return jnp.transpose(out.reshape(N, Ho, Wo, Pe), (0, 3, 1, 2))


def init_params(key, in_planes, planes, stride):
    """Synthetic parameters matching the PyTorch module's shapes.

    Conv weights are stored MXU-ready in bf16:
      w1 (Cin, P), w3 (P, 4P), wsc (Cin, 4P)   -- 1x1 convs as plain matmuls
      w2 (3, 3P, P)                            -- [kh, kw*P + ci, co] (HWIO reshaped)
    BatchNorm (gamma, beta, running stats) folded into per-channel f32
    (scale, bias).  The identity-shortcut case has no 'wsc' entry."""
    pe = EXPANSION * planes
    ks = jax.random.split(key, 8)

    def bn_fold(k, c):
        kg, kb, km, kv = jax.random.split(k, 4)
        gamma = 1.0 + 0.1 * jax.random.normal(kg, (c,), jnp.float32)
        beta = 0.1 * jax.random.normal(kb, (c,), jnp.float32)
        mean = 0.1 * jax.random.normal(km, (c,), jnp.float32)
        var = jax.random.uniform(kv, (c,), jnp.float32, 0.5, 1.5)
        scale = gamma / jnp.sqrt(var + 1e-5)
        bias = beta - mean * scale
        return scale.reshape(1, c), bias.reshape(1, c)

    s1, b1 = bn_fold(ks[0], in_planes)
    s2, b2 = bn_fold(ks[1], planes)
    s3, b3 = bn_fold(ks[2], planes)
    w1 = (0.3 * jax.random.normal(ks[3], (in_planes, planes), jnp.float32)
          ).astype(jnp.bfloat16)
    w2 = (0.3 * jax.random.normal(ks[4], (3, 3, planes, planes), jnp.float32)
          ).reshape(3, 3 * planes, planes).astype(jnp.bfloat16)
    w3 = (0.3 * jax.random.normal(ks[5], (planes, pe), jnp.float32)
          ).astype(jnp.bfloat16)
    p = dict(s1=s1, b1=b1, s2=s2, b2=b2, s3=s3, b3=b3, w1=w1, w2=w2, w3=w3)
    if stride != 1 or in_planes != pe:
        p['wsc'] = (0.3 * jax.random.normal(ks[6], (in_planes, pe), jnp.float32)
                    ).astype(jnp.bfloat16)
    return p


def reference(x_nchw, p, stride):
    """Pure-JAX (XLA conv) reference using the same bf16-rounded weights/input."""
    x = jnp.transpose(x_nchw, (0, 2, 3, 1)).astype(jnp.bfloat16).astype(jnp.float32)
    Cin = x.shape[-1]
    P = p['w1'].shape[1]
    Pe = p['w3'].shape[1]
    dn = ('NHWC', 'HWIO', 'NHWC')
    conv = lambda a, w, s, pad: lax.conv_general_dilated(
        a, w.astype(jnp.float32), (s, s), pad, dimension_numbers=dn)
    a1 = jax.nn.relu(x * p['s1'] + p['b1'])
    if 'wsc' in p:
        sc = conv(a1, p['wsc'].reshape(1, 1, Cin, Pe), stride, [(0, 0), (0, 0)])
    else:
        sc = a1                                   # identity shortcut on relu(bn1(x))
    o = conv(a1, p['w1'].reshape(1, 1, Cin, P), 1, [(0, 0), (0, 0)])
    o = jax.nn.relu(o * p['s2'] + p['b2'])
    o = conv(o, p['w2'].reshape(3, 3, P, P), stride, [(1, 1), (1, 1)])
    o = jax.nn.relu(o * p['s3'] + p['b3'])
    o = conv(o, p['w3'].reshape(1, 1, P, Pe), 1, [(0, 0), (0, 0)]) + sc
    return jnp.transpose(o, (0, 3, 1, 2))


if __name__ == "__main__":
    key = jax.random.PRNGKey(0)
    N = 2
    # (in_planes, planes, H, W, stride):
    #   1) projection shortcut (in_planes != 4*planes) -> fused conv1+wsc MXU pass
    #   2) identity-shortcut fast path (in_planes == 4*planes, stride == 1)
    configs = [(64, 32, 16, 16, 1), (128, 32, 16, 16, 1)]

    fwd = jax.jit(preact_bottleneck, static_argnames='stride')

    for i, (cin, planes, H, W, stride) in enumerate(configs):
        key, kx, kp = jax.random.split(key, 3)
        x = jax.random.normal(kx, (N, cin, H, W), jnp.float32)   # NCHW like PyTorch
        params = init_params(kp, cin, planes, stride)

        out = jax.block_until_ready(fwd(x, params, stride=stride))
        assert out.shape == (N, EXPANSION * planes, H // stride, W // stride), out.shape

        ref = reference(x, params, stride)
        err = float(jnp.max(jnp.abs(out.astype(jnp.float32) - ref)))
        scale = max(1.0, float(jnp.max(jnp.abs(ref))))
        if err > 2e-2 * scale:
            raise SystemExit(f"config {i}: mismatch, max abs err {err:.4f} "
                             f"(ref scale {scale:.2f})")

    print("KERNEL_OK")
</pallas_src>

<mosaic_0001>
module attributes {stable_mosaic.version = 11 : i64} {
  func.func @kernel(%arg0: i32, %arg1: memref<1x16x16x64xbf16, #tpu.memory_space<vmem>>, %arg2: memref<1x64xf32, #tpu.memory_space<vmem>>, %arg3: memref<1x64xf32, #tpu.memory_space<vmem>>, %arg4: memref<64x160xbf16, #tpu.memory_space<vmem>>, %arg5: memref<1x32xf32, #tpu.memory_space<vmem>>, %arg6: memref<1x32xf32, #tpu.memory_space<vmem>>, %arg7: memref<3x96x32xbf16, #tpu.memory_space<vmem>>, %arg8: memref<1x32xf32, #tpu.memory_space<vmem>>, %arg9: memref<1x32xf32, #tpu.memory_space<vmem>>, %arg10: memref<32x128xbf16, #tpu.memory_space<vmem>>, %arg11: memref<1x256x128xbf16, #tpu.memory_space<vmem>>, %arg12: memref<18x16x96xbf16, #tpu.memory_space<vmem>>) attributes {dimension_semantics = [#tpu.dimension_semantics<parallel>], iteration_bounds = array<i64: 2>, scalar_prefetch = 0 : i64, scratch_operands = 1 : i64, tpu.core_type = #tpu.core_type<tc>, window_params = [{transform_indices = @transform_0, window_bounds = array<i64: 1, 16, 16, 64>}, {pipeline_mode = #tpu.pipeline_mode<synchronous>, transform_indices = @transform_1, window_bounds = array<i64: 1, 64>}, {pipeline_mode = #tpu.pipeline_mode<synchronous>, transform_indices = @transform_2, window_bounds = array<i64: 1, 64>}, {pipeline_mode = #tpu.pipeline_mode<synchronous>, transform_indices = @transform_3, window_bounds = array<i64: 64, 160>}, {pipeline_mode = #tpu.pipeline_mode<synchronous>, transform_indices = @transform_4, window_bounds = array<i64: 1, 32>}, {pipeline_mode = #tpu.pipeline_mode<synchronous>, transform_indices = @transform_5, window_bounds = array<i64: 1, 32>}, {pipeline_mode = #tpu.pipeline_mode<synchronous>, transform_indices = @transform_6, window_bounds = array<i64: 3, 96, 32>}, {pipeline_mode = #tpu.pipeline_mode<synchronous>, transform_indices = @transform_7, window_bounds = array<i64: 1, 32>}, {pipeline_mode = #tpu.pipeline_mode<synchronous>, transform_indices = @transform_8, window_bounds = array<i64: 1, 32>}, {pipeline_mode = #tpu.pipeline_mode<synchronous>, transform_indices = @transform_9, window_bounds = array<i64: 32, 128>}, {transform_indices = @transform_10, window_bounds = array<i64: 1, 256, 128>}]} {
    %c0 = arith.constant 0 : index
    %c0_0 = arith.constant 0 : index
    %c0_1 = arith.constant 0 : index
    %c0_2 = arith.constant 0 : index
    %0 = vector.load %arg1[%c0, %c0_0, %c0_1, %c0_2] : memref<1x16x16x64xbf16, #tpu.memory_space<vmem>>, vector<1x16x16x64xbf16>
    %1 = vector.shape_cast %0 : vector<1x16x16x64xbf16> to vector<16x16x64xbf16>
    %2 = arith.extf %1 : vector<16x16x64xbf16> to vector<16x16x64xf32>
    %c0_3 = arith.constant 0 : index
    %c0_4 = arith.constant 0 : index
    %3 = vector.load %arg2[%c0_3, %c0_4] : memref<1x64xf32, #tpu.memory_space<vmem>>, vector<1x64xf32>
    %4 = vector.shape_cast %3 : vector<1x64xf32> to vector<1x1x64xf32>
    %5 = vector.broadcast %4 : vector<1x1x64xf32> to vector<16x16x64xf32>
    %6 = arith.mulf %2, %5 : vector<16x16x64xf32>
    %c0_5 = arith.constant 0 : index
    %c0_6 = arith.constant 0 : index
    %7 = vector.load %arg3[%c0_5, %c0_6] : memref<1x64xf32, #tpu.memory_space<vmem>>, vector<1x64xf32>
    %8 = vector.shape_cast %7 : vector<1x64xf32> to vector<1x1x64xf32>
    %9 = vector.broadcast %8 : vector<1x1x64xf32> to vector<16x16x64xf32>
    %10 = arith.addf %6, %9 : vector<16x16x64xf32>
    %cst = arith.constant 0.000000e+00 : f32
    %11 = vector.broadcast %cst : f32 to vector<16x16x64xf32>
    %12 = arith.maximumf %10, %11 : vector<16x16x64xf32>
    %13 = vector.shape_cast %12 : vector<16x16x64xf32> to vector<256x64xf32>
    %14 = arith.truncf %13 : vector<256x64xf32> to vector<256x64xbf16>
    %c0_7 = arith.constant 0 : index
    %c0_8 = arith.constant 0 : index
    %15 = vector.load %arg4[%c0_7, %c0_8] : memref<64x160xbf16, #tpu.memory_space<vmem>>, vector<64x160xbf16>
    %cst_9 = arith.constant dense<0.000000e+00> : vector<256x160xf32>
    %16 = tpu.matmul %14, %15, %cst_9 {dimension_numbers = #tpu.dot_dimension_numbers<[1], [0], [0], [1], [0, 0, 1, 1], [], []>} : vector<256x64xbf16>, vector<64x160xbf16>, vector<256x160xf32> -> vector<256x160xf32>
    %17 = vector.extract_strided_slice %16 {offsets = [0, 0], sizes = [256, 128], strides = [1, 1]} : vector<256x160xf32> to vector<256x128xf32>
    %18 = vector.extract_strided_slice %16 {offsets = [0, 128], sizes = [256, 32], strides = [1, 1]} : vector<256x160xf32> to vector<256x32xf32>
    %c0_10 = arith.constant 0 : index
    %c0_11 = arith.constant 0 : index
    %19 = vector.load %arg5[%c0_10, %c0_11] : memref<1x32xf32, #tpu.memory_space<vmem>>, vector<1x32xf32>
    %20 = vector.broadcast %19 : vector<1x32xf32> to vector<256x32xf32>
    %21 = arith.mulf %18, %20 : vector<256x32xf32>
    %c0_12 = arith.constant 0 : index
    %c0_13 = arith.constant 0 : index
    %22 = vector.load %arg6[%c0_12, %c0_13] : memref<1x32xf32, #tpu.memory_space<vmem>>, vector<1x32xf32>
    %23 = vector.broadcast %22 : vector<1x32xf32> to vector<256x32xf32>
    %24 = arith.addf %21, %23 : vector<256x32xf32>
    %cst_14 = arith.constant 0.000000e+00 : f32
    %25 = vector.broadcast %cst_14 : f32 to vector<256x32xf32>
    %26 = arith.maximumf %24, %25 : vector<256x32xf32>
    %27 = arith.truncf %26 : vector<256x32xf32> to vector<256x32xbf16>
    %28 = vector.shape_cast %27 : vector<256x32xbf16> to vector<16x16x32xbf16>
    %cst_15 = arith.constant 0.000000e+00 : bf16
    %29 = vector.broadcast %cst_15 : bf16 to vector<16x1x32xbf16>
    %cst_16 = arith.constant 0.000000e+00 : bf16
    %30 = vector.broadcast %cst_16 : bf16 to vector<1x16x96xbf16>
    %c1 = arith.constant 1 : index
    %c0_17 = arith.constant 0 : index
    %c32 = arith.constant 32 : index
    %31 = vector.load %arg12[%c1, %c0_17, %c32] : memref<18x16x96xbf16, #tpu.memory_space<vmem>>, vector<16x16x32xbf16>
    tpu.vector_store %arg12[%c1, %c0_17, %c32], %28 {strides = array<i32>} : memref<18x16x96xbf16, #tpu.memory_space<vmem>>, vector<16x16x32xbf16>,
    %32 = vector.extract_strided_slice %28 {offsets = [0, 0, 0], sizes = [16, 15, 32], strides = [1, 1, 1]} : vector<16x16x32xbf16> to vector<16x15x32xbf16>
    %c1_18 = arith.constant 1 : index
    %c1_19 = arith.constant 1 : index
    %c0_20 = arith.constant 0 : index
    %33 = vector.load %arg12[%c1_18, %c1_19, %c0_20] : memref<18x16x96xbf16, #tpu.memory_space<vmem>>, vector<16x15x32xbf16>
    tpu.vector_store %arg12[%c1_18, %c1_19, %c0_20], %32 {strides = array<i32>} : memref<18x16x96xbf16, #tpu.memory_space<vmem>>, vector<16x15x32xbf16>,
    %c1_21 = arith.constant 1 : index
    %c0_22 = arith.constant 0 : index
    %c0_23 = arith.constant 0 : index
    %34 = vector.load %arg12[%c1_21, %c0_22, %c0_23] : memref<18x16x96xbf16, #tpu.memory_space<vmem>>, vector<16x1x32xbf16>
    tpu.vector_store %arg12[%c1_21, %c0_22, %c0_23], %29 {strides = array<i32>} : memref<18x16x96xbf16, #tpu.memory_space<vmem>>, vector<16x1x32xbf16>,
    %35 = vector.extract_strided_slice %28 {offsets = [0, 1, 0], sizes = [16, 15, 32], strides = [1, 1, 1]} : vector<16x16x32xbf16> to vector<16x15x32xbf16>
    %c1_24 = arith.constant 1 : index
    %c0_25 = arith.constant 0 : index
    %c64 = arith.constant 64 : index
    %36 = vector.load %arg12[%c1_24, %c0_25, %c64] : memref<18x16x96xbf16, #tpu.memory_space<vmem>>, vector<16x15x32xbf16>
    tpu.vector_store %arg12[%c1_24, %c0_25, %c64], %35 {strides = array<i32>} : memref<18x16x96xbf16, #tpu.memory_space<vmem>>, vector<16x15x32xbf16>,
    %c1_26 = arith.constant 1 : index
    %c15 = arith.constant 15 : index
    %c64_27 = arith.constant 64 : index
    %37 = vector.load %arg12[%c1_26, %c15, %c64_27] : memref<18x16x96xbf16, #tpu.memory_space<vmem>>, vector<16x1x32xbf16>
    tpu.vector_store %arg12[%c1_26, %c15, %c64_27], %29 {strides = array<i32>} : memref<18x16x96xbf16, #tpu.memory_space<vmem>>, vector<16x1x32xbf16>,
    %c0_28 = arith.constant 0 : index
    %c0_29 = arith.constant 0 : index
    %c0_30 = arith.constant 0 : index
    %38 = vector.load %arg12[%c0_28, %c0_29, %c0_30] : memref<18x16x96xbf16, #tpu.memory_space<vmem>>, vector<1x16x96xbf16>
    tpu.vector_store %arg12[%c0_28, %c0_29, %c0_30], %30 {strides = array<i32>} : memref<18x16x96xbf16, #tpu.memory_space<vmem>>, vector<1x16x96xbf16>,
    %c17 = arith.constant 17 : index
    %c0_31 = arith.constant 0 : index
    %c0_32 = arith.constant 0 : index
    %39 = vector.load %arg12[%c17, %c0_31, %c0_32] : memref<18x16x96xbf16, #tpu.memory_space<vmem>>, vector<1x16x96xbf16>
    tpu.vector_store %arg12[%c17, %c0_31, %c0_32], %30 {strides = array<i32>} : memref<18x16x96xbf16, #tpu.memory_space<vmem>>, vector<1x16x96xbf16>,
    %c0_33 = arith.constant 0 : index
    %c0_34 = arith.constant 0 : index
    %c0_35 = arith.constant 0 : index
    %40 = vector.load %arg12[%c0_33, %c0_34, %c0_35] : memref<18x16x96xbf16, #tpu.memory_space<vmem>>, vector<16x16x96xbf16>
    %41 = vector.shape_cast %40 : vector<16x16x96xbf16> to vector<256x96xbf16>
    %c0_36 = arith.constant 0 : index
    %c0_37 = arith.constant 0 : index
    %c0_38 = arith.constant 0 : index
    %42 = vector.load %arg7[%c0_36, %c0_37, %c0_38] : memref<3x96x32xbf16, #tpu.memory_space<vmem>>, vector<1x96x32xbf16>
    %43 = vector.shape_cast %42 : vector<1x96x32xbf16> to vector<96x32xbf16>
    %cst_39 = arith.constant dense<0.000000e+00> : vector<256x32xf32>
    %44 = tpu.matmul %41, %43, %cst_39 {dimension_numbers = #tpu.dot_dimension_numbers<[1], [0], [0], [1], [0, 0, 1, 1], [], []>} : vector<256x96xbf16>, vector<96x32xbf16>, vector<256x32xf32> -> vector<256x32xf32>
    %c1_40 = arith.constant 1 : index
    %c0_41 = arith.constant 0 : index
    %c0_42 = arith.constant 0 : index
    %45 = vector.load %arg12[%c1_40, %c0_41, %c0_42] : memref<18x16x96xbf16, #tpu.memory_space<vmem>>, vector<16x16x96xbf16>
    %46 = vector.shape_cast %45 : vector<16x16x96xbf16> to vector<256x96xbf16>
    %c1_43 = arith.constant 1 : index
    %c0_44 = arith.constant 0 : index
    %c0_45 = arith.constant 0 : index
    %47 = vector.load %arg7[%c1_43, %c0_44, %c0_45] : memref<3x96x32xbf16, #tpu.memory_space<vmem>>, vector<1x96x32xbf16>
    %48 = vector.shape_cast %47 : vector<1x96x32xbf16> to vector<96x32xbf16>
    %cst_46 = arith.constant dense<0.000000e+00> : vector<256x32xf32>
    %49 = tpu.matmul %46, %48, %cst_46 {dimension_numbers = #tpu.dot_dimension_numbers<[1], [0], [0], [1], [0, 0, 1, 1], [], []>} : vector<256x96xbf16>, vector<96x32xbf16>, vector<256x32xf32> -> vector<256x32xf32>
    %50 = arith.addf %44, %49 : vector<256x32xf32>
    %c2 = arith.constant 2 : index
    %c0_47 = arith.constant 0 : index
    %c0_48 = arith.constant 0 : index
    %51 = vector.load %arg12[%c2, %c0_47, %c0_48] : memref<18x16x96xbf16, #tpu.memory_space<vmem>>, vector<16x16x96xbf16>
    %52 = vector.shape_cast %51 : vector<16x16x96xbf16> to vector<256x96xbf16>
    %c2_49 = arith.constant 2 : index
    %c0_50 = arith.constant 0 : index
    %c0_51 = arith.constant 0 : index
    %53 = vector.load %arg7[%c2_49, %c0_50, %c0_51] : memref<3x96x32xbf16, #tpu.memory_space<vmem>>, vector<1x96x32xbf16>
    %54 = vector.shape_cast %53 : vector<1x96x32xbf16> to vector<96x32xbf16>
    %cst_52 = arith.constant dense<0.000000e+00> : vector<256x32xf32>
    %55 = tpu.matmul %52, %54, %cst_52 {dimension_numbers = #tpu.dot_dimension_numbers<[1], [0], [0], [1], [0, 0, 1, 1], [], []>} : vector<256x96xbf16>, vector<96x32xbf16>, vector<256x32xf32> -> vector<256x32xf32>
    %56 = arith.addf %50, %55 : vector<256x32xf32>
    %c0_53 = arith.constant 0 : index
    %c0_54 = arith.constant 0 : index
    %57 = vector.load %arg8[%c0_53, %c0_54] : memref<1x32xf32, #tpu.memory_space<vmem>>, vector<1x32xf32>
    %58 = vector.broadcast %57 : vector<1x32xf32> to vector<256x32xf32>
    %59 = arith.mulf %56, %58 : vector<256x32xf32>
    %c0_55 = arith.constant 0 : index
    %c0_56 = arith.constant 0 : index
    %60 = vector.load %arg9[%c0_55, %c0_56] : memref<1x32xf32, #tpu.memory_space<vmem>>, vector<1x32xf32>
    %61 = vector.broadcast %60 : vector<1x32xf32> to vector<256x32xf32>
    %62 = arith.addf %59, %61 : vector<256x32xf32>
    %cst_57 = arith.constant 0.000000e+00 : f32
    %63 = vector.broadcast %cst_57 : f32 to vector<256x32xf32>
    %64 = arith.maximumf %62, %63 : vector<256x32xf32>
    %65 = arith.truncf %64 : vector<256x32xf32> to vector<256x32xbf16>
    %c0_58 = arith.constant 0 : index
    %c0_59 = arith.constant 0 : index
    %66 = vector.load %arg10[%c0_58, %c0_59] : memref<32x128xbf16, #tpu.memory_space<vmem>>, vector<32x128xbf16>
    %cst_60 = arith.constant dense<0.000000e+00> : vector<256x128xf32>
    %67 = tpu.matmul %65, %66, %cst_60 {dimension_numbers = #tpu.dot_dimension_numbers<[1], [0], [0], [1], [0, 0, 1, 1], [], []>} : vector<256x32xbf16>, vector<32x128xbf16>, vector<256x128xf32> -> vector<256x128xf32>
    %68 = arith.addf %67, %17 : vector<256x128xf32>
    %69 = arith.truncf %68 : vector<256x128xf32> to vector<256x128xbf16>
    %c0_61 = arith.constant 0 : index
    %c0_62 = arith.constant 0 : index
    %c0_63 = arith.constant 0 : index
    %70 = vector.load %arg11[%c0_61, %c0_62, %c0_63] : memref<1x256x128xbf16, #tpu.memory_space<vmem>>, vector<1x256x128xbf16>
    %71 = vector.shape_cast %70 : vector<1x256x128xbf16> to vector<256x128xbf16>
    %72 = vector.shape_cast %69 : vector<256x128xbf16> to vector<1x256x128xbf16>
    tpu.vector_store %arg11[%c0_61, %c0_62, %c0_63], %72 {strides = array<i32>} : memref<1x256x128xbf16, #tpu.memory_space<vmem>>, vector<1x256x128xbf16>,
    return
  }
  func.func @transform_0(%arg0: i32) -> (i32, i32, i32, i32) {
    %c0_i32 = arith.constant 0 : i32
    %c0_i32_0 = arith.constant 0 : i32
    %c0_i32_1 = arith.constant 0 : i32
    %c0_i32_2 = arith.constant 0 : i32
    return %arg0, %c0_i32, %c0_i32_0, %c0_i32_1 : i32, i32, i32, i32
  }
  func.func @transform_1(%arg0: i32) -> (i32, i32) {
    %c0_i32 = arith.constant 0 : i32
    %c0_i32_0 = arith.constant 0 : i32
    %c0_i32_1 = arith.constant 0 : i32
    return %c0_i32, %c0_i32_0 : i32, i32
  }
  func.func @transform_2(%arg0: i32) -> (i32, i32) {
    %c0_i32 = arith.constant 0 : i32
    %c0_i32_0 = arith.constant 0 : i32
    %c0_i32_1 = arith.constant 0 : i32
    return %c0_i32, %c0_i32_0 : i32, i32
  }
  func.func @transform_3(%arg0: i32) -> (i32, i32) {
    %c0_i32 = arith.constant 0 : i32
    %c0_i32_0 = arith.constant 0 : i32
    %c0_i32_1 = arith.constant 0 : i32
    return %c0_i32, %c0_i32_0 : i32, i32
  }
  func.func @transform_4(%arg0: i32) -> (i32, i32) {
    %c0_i32 = arith.constant 0 : i32
    %c0_i32_0 = arith.constant 0 : i32
    %c0_i32_1 = arith.constant 0 : i32
    return %c0_i32, %c0_i32_0 : i32, i32
  }
  func.func @transform_5(%arg0: i32) -> (i32, i32) {
    %c0_i32 = arith.constant 0 : i32
    %c0_i32_0 = arith.constant 0 : i32
    %c0_i32_1 = arith.constant 0 : i32
    return %c0_i32, %c0_i32_0 : i32, i32
  }
  func.func @transform_6(%arg0: i32) -> (i32, i32, i32) {
    %c0_i32 = arith.constant 0 : i32
    %c0_i32_0 = arith.constant 0 : i32
    %c0_i32_1 = arith.constant 0 : i32
    %c0_i32_2 = arith.constant 0 : i32
    return %c0_i32, %c0_i32_0, %c0_i32_1 : i32, i32, i32
  }
  func.func @transform_7(%arg0: i32) -> (i32, i32) {
    %c0_i32 = arith.constant 0 : i32
    %c0_i32_0 = arith.constant 0 : i32
    %c0_i32_1 = arith.constant 0 : i32
    return %c0_i32, %c0_i32_0 : i32, i32
  }
  func.func @transform_8(%arg0: i32) -> (i32, i32) {
    %c0_i32 = arith.constant 0 : i32
    %c0_i32_0 = arith.constant 0 : i32
    %c0_i32_1 = arith.constant 0 : i32
    return %c0_i32, %c0_i32_0 : i32, i32
  }
  func.func @transform_9(%arg0: i32) -> (i32, i32) {
    %c0_i32 = arith.constant 0 : i32
    %c0_i32_0 = arith.constant 0 : i32
    %c0_i32_1 = arith.constant 0 : i32
    return %c0_i32, %c0_i32_0 : i32, i32
  }
  func.func @transform_10(%arg0: i32) -> (i32, i32, i32) {
    %c0_i32 = arith.constant 0 : i32
    %c0_i32_0 = arith.constant 0 : i32
    %c0_i32_1 = arith.constant 0 : i32
    return %arg0, %c0_i32, %c0_i32_0 : i32, i32, i32
  }
}

</mosaic_0001>

<bundles_post_ra>
// kernel: preact_bottleneck.1
= control target key start
LH: loop header
LB: loop body
LE: loop exit
PB: predicated region body
PF: predicated region fallthrough
CT: control target
= control target key end

     0   :  { %15 = vsyncpa [#allocation4], 0  ;;  %s5549_s0 = inlined_call_operand.vmem [shape: bf16[2,16,16,64], index: 0, kind: input, shape index: {}]   ;;  %s5550_s1 = inlined_call_operand.vmem [shape: f32[1,64], index: 1, kind: input, shape index: {}]   ;;  %s5551_s2 = inlined_call_operand.vmem [shape: f32[1,64], index: 2, kind: input, shape index: {}]   ;;  %s5552_s3 = inlined_call_operand.vmem [shape: bf16[64,160], index: 3, kind: input, shape index: {}]   ;;  %s5553_s4 = inlined_call_operand.vmem [shape: f32[1,32], index: 4, kind: input, shape index: {}]   ;;  %s5554_s5 = inlined_call_operand.vmem [shape: f32[1,32], index: 5, kind: input, shape index: {}]   ;;  %s5555_s6 = inlined_call_operand.vmem [shape: bf16[3,96,32], index: 6, kind: input, shape index: {}]   ;;  %s5556_s7 = inlined_call_operand.vmem [shape: f32[1,32], index: 7, kind: input, shape index: {}]   ;;  %s5557_s8 = inlined_call_operand.vmem [shape: f32[1,32], index: 8, kind: input, shape index: {}]   ;;  %s5558_s9 = inlined_call_operand.vmem [shape: bf16[32,128], index: 9, kind: input, shape index: {}]   ;;  %s5559_s10 = inlined_call_operand.hbm [shape: bf16[2,256,128], index: 10, kind: output, shape index: {}]  }
   0x1   :  { %17 = vsyncpa [#allocation4 + $0x1], 0  ;;  %s4111_s13 = smov 0   ;;  %s4113_s14 = smov 0  }
   0x2   :  { %s4115_s15 = smov 0   ;;  %s4117_s16 = smov 0  }
   0x3 LB: > { %s4132_s17 = sadd.s32 4294967295, %s4050_s16   ;;  %s3235_s18 = sadd.s32 4294967294, %s4050_s16   ;;  %s4050_s16 = sphi %s4117_s16, %s5583_s16   ;;  %s4046_s15 = sphi %s4115_s15, %s5582_s15   ;;  %s4042_s14 = sphi %s4113_s14, %s5581_s14   ;;  %s4038_s13 = sphi %s4111_s13, %s5580_s13  }
   0x4   : > { %s4136_s19 = sadd.s32 1, %s4050_s16   ;;  %s245_s20 = sadd.s32 1, %s4046_s15 }
   0x5   : > { %s242_s21 = ssub.s32 %s4050_s16, %s4136_s19  ;;  %p255_p0 = scmp.ne.s32.totalorder %s4046_s15, %s4042_s14 }
   0x6   : > { %p243_p1 = scmp.eq.s32.totalorder %s242_s21, 0  ;;  %p256_p2 = scmp.eq.s32.totalorder %s4132_s17, 1 }
   0x7   : > { %p261_p3 = scmp.ne.s32.totalorder %s4042_s14, %s4038_s13  ;;  %p262_p4 = scmp.eq.s32.totalorder %s3235_s18, 1 }
   0x8   : > { %s4147_s22 = scalar_select %p243_p1, %s4046_s15, %s245_s20  }
   0x9   : > { %p4149_p5 = por %p256_p2, %p255_p0  ;;  %p4153_p6 = por %p262_p4, %p261_p3 }
   0xa   : > { %p3238_p7 = scmp.ge.s32.totalorder %s4050_s16, 1  ;;  %p315_p8 = scmp.lt.s32.totalorder %s4050_s16, 3 }
   0xc   : > { %p316_p9 = pnand %p3238_p7, %p315_p8 }
   0xe   : > { %319 = sbr.rel (%p316_p9) target bundleno = 872 (0x368), region = 60 }
  0x13   : > { %v3678_v0 = vld [vmem:[%s5552_s3 + $0x34] sm:$0xf]  ;;  %v3270_v1 = vld [vmem:[%s5552_s3 + $0x38] sm:$0xf0]  ;;  %v3676_v2 = vld [vmem:[%s5552_s3 + $0x24] sm:$0xf] }
  0x14   : > { %v3273_v3 = vor.u32 %v3678_v0, %v3270_v1  ;;  %v3262_v4 = vld [vmem:[%s5552_s3 + $0x28] sm:$0xf0]  ;;  %p353_p10 = scmp.lt.s32.totalorder %s4132_s17, 1  ;;  %v3674_v6 = vld [vmem:[%s5552_s3 + $0x14] sm:$0xf]  ;;  %vm591_vm0 = vcmask 523264  }
  0x15   : > { %v3265_v5 = vor.u32 %v3676_v2, %v3262_v4  ;;  %v3254_v7 = vld [vmem:[%s5552_s3 + $0x18] sm:$0xf0]  ;;  %v4187_v9 = vld [vmem:[%s5550_s1] ss:$0 sm:$0xff]  ;;  %v3672_v10 = vld [vmem:[%s5552_s3 + $0x4] sm:$0xf] }
  0x16   : > { %733 = vmatpush.bf16.msra.mxu1 %v3273_v3  ;;  %3927 = vmatpush.bf16.msra.mxu3 %v3273_v3  ;;  %s354_s26 = scalar_select %p353_p10, %s4132_s17, 1  ;;  %v3257_v8 = vor.u32 %v3674_v6, %v3254_v7  ;;  %v3246_v11 = vld [vmem:[%s5552_s3 + $0x8] sm:$0xf0]  ;;  %v4199_v15 = vld [vmem:[%s5551_s2] ss:$0 sm:$0xff]  ;;  %vm1886_vm7 = vcmask 781312  }
  0x17   : > { %v3249_v16 = vor.u32 %v3672_v10, %v3246_v11  ;;  %s4052_s28 = smov 32   ;;  %vm1116_vm1 = vsmask.f32 256  ;;  %vm1117_vm2 = vsmask.f32 4368  ;;  %s5560_s20 = smov 64  }
  0x18   : > { %s3671_s27 = sshll.u32 %s354_s26, 7  ;;  %vm4402_vm3 = vmor %vm1116_vm1, %vm1117_vm2  ;;  %vm1525_vm4 = vsmask.f32 3328  ;;  %vm1526_vm5 = vsmask.f32 7440  ;;  %vm2097_vm8 = vcmask 785408  }
  0x19   : > { %s4182_s30 = scalar_lea.vmem %s5549_s0, %s3671_s27  ;;  %vm4443_vm6 = vmor %vm1525_vm4, %vm1526_vm5  ;;  %vm1083_vm9 = vcmask 519424   ;;  %vm1407_vm10 = vcmask 257024   ;;  %vm1408_vm11 = vsmask.f32 7938  ;;  %vm1475_vm13 = vcmask 253952   ;;  %s350_s12 = sand.u32 1, %s4042_s14  }
  0x1a   : > { %734 = vmatpush.bf16.msra.mxu1 %v3265_v5  ;;  %3928 = vmatpush.bf16.msra.mxu3 %v3265_v5  ;;  %v3750_v12 = vld [vmem:[%s4182_s30] sm:$0xff]   ;;  %v3893_v19 = vld [vmem:[%s4182_s30 + $0x8] sm:$0xff]   ;;  %v3894_v33 = vld [vmem:[%s4182_s30 + $0x10] sm:$0xff]   ;;  %vm1768_vm14 = vcmask 781824   ;;  %vm1836_vm2 = vsmask.f32 7950 }
  0x1b   : > { %v3751_v13 = vunpack.c.l.bf16 %v3750_v12  ;;  %v3752_v14 = vunpack.c.h.bf16 %v3750_v12  ;;  %v3755_v24 = vunpack.c.l.bf16 %v3893_v19  ;;  %v3756_v25 = vunpack.c.h.bf16 %v3893_v19  ;;  %v3895_v43 = vld [vmem:[%s4182_s30 + $0x18] sm:$0xff]   ;;  %v3900_v51 = vld [vmem:[%s4182_s30 + $0x40] sm:$0xff]   ;;  %v3901_v10 = vld [vmem:[%s4182_s30 + $0x48] sm:$0xff]   ;;  %s3239_s18 = sshll.u32 %s350_s12, 7  ;;  %s3748_s25 = sshll.u32 %s4132_s17, 7 }
  0x1c   : > { %v3759_v35 = vunpack.c.l.bf16 %v3894_v33  ;;  %v3760_v36 = vunpack.c.h.bf16 %v3894_v33  ;;  %v3763_v45 = vunpack.c.l.bf16 %v3895_v43  ;;  %v3764_v46 = vunpack.c.h.bf16 %v3895_v43  ;;  %v3896_v54 = vld [vmem:[%s4182_s30 + $0x20] sm:$0xff]   ;;  %v3898_v33 = vld [vmem:[%s4182_s30 + $0x30] sm:$0xff]   ;;  %vm4718_vm12 = vmand %vm1407_vm10, %vm1408_vm11  ;;  %s5434_s21 = scalar_lea.vmem [#allocation3], %s3239_s18  ;;  %s3169_s27 = scalar_lea.hbm %s5559_s10, %s3748_s25 }
  0x1d   : > { %v427_v17 = vmul.f32 %v4187_v9, %v3751_v13  ;;  %v428_v18 = vmul.f32 %v4187_v9, %v3752_v14  ;;  %v429_v27 = vmul.f32 %v4187_v9, %v3755_v24  ;;  %v430_v28 = vmul.f32 %v4187_v9, %v3756_v25  ;;  %v3897_v13 = vld [vmem:[%s4182_s30 + $0x28] sm:$0xff]   ;;  %vm4772_vm15 = vmand %vm1475_vm13, %vm1116_vm1  ;;  %s3172_s29 = sshll.u32 %s3169_s27, 4  ;;  %s3158_s11 = scalar_lea.sflag [#allocation4], %s350_s12  ;;  %s3173_s29 = int_to_ptr.hbm [resolvable:$true] %s3172_s29 }
  0x1e   : > { %735 = vmatpush.bf16.msra.mxu1 %v3257_v8  ;;  %3929 = vmatpush.bf16.msra.mxu3 %v3257_v8  ;;  %v431_v37 = vmul.f32 %v4187_v9, %v3759_v35  ;;  %v432_v38 = vmul.f32 %v4187_v9, %v3760_v36  ;;  %v433_v47 = vmul.f32 %v4187_v9, %v3763_v45  ;;  %v3783_v55 = vunpack.c.l.bf16 %v3900_v51  ;;  %s4002_s18 = sshra.s32 %s3173_s29, 4  ;;  %s4008_s26 = scalar_lea.hbm %s5559_s10, 256  ;;  %s4003_s18 = int_to_ptr.hbm [resolvable:$true] %s4002_s18 }
  0x1f   : > { %v463_v20 = vadd.f32 %v4199_v15, %v427_v17  ;;  %v464_v21 = vadd.f32 %v4199_v15, %v428_v18  ;;  %v465_v29 = vadd.f32 %v4199_v15, %v429_v27  ;;  %v466_v30 = vadd.f32 %v4199_v15, %v430_v28  ;;  %s4004_s17 = scalar_lea.hbm %s4003_s18, 128  ;;  %p4009_p0 = scmp.lt.s32.totalorder %s4003_s18, %s5559_s10 }
  0x20   : > { %v467_v39 = vadd.f32 %v4199_v15, %v431_v37  ;;  %v468_v40 = vadd.f32 %v4199_v15, %v432_v38  ;;  %v434_v48 = vmul.f32 %v4187_v9, %v3764_v46  ;;  %v469_v49 = vadd.f32 %v4199_v15, %v433_v47  ;;  %p4005_p11 = scmp.ne.s32.totalorder %s4003_s18, %s4004_s17  ;;  %p4010_p1 = scmp.lt.s32.totalorder %s4008_s26, %s4004_s17 }
  0x21   : > { %v495_v22 = vmax.f32 %v463_v20, 0.0  ;;  %v496_v23 = vmax.f32 %v464_v21, 0.0  ;;  %v497_v31 = vmax.f32 %v465_v29, 0.0  ;;  %v498_v32 = vmax.f32 %v466_v30, 0.0  ;;  %v3902_v30 = vld [vmem:[%s4182_s30 + $0x50] sm:$0xff]  }
  0x22   : > { %736 = vmatpush.bf16.msra.mxu1 %v3249_v16  ;;  %3930 = vmatpush.bf16.msra.mxu3 %v3249_v16  ;;  %v499_v41 = vmax.f32 %v467_v39, 0.0  ;;  %v500_v42 = vmax.f32 %v468_v40, 0.0  ;;  %v470_v50 = vadd.f32 %v4199_v15, %v434_v48  ;;  %v501_v52 = vmax.f32 %v469_v49, 0.0  ;;  %p4006_p12 = pnand %p4005_p11, %p4149_p5  ;;  %p4011_p2 = por %p4010_p1, %p4009_p0 }
  0x23   : > { %v4206_v26 = vpack.c.bf16 %v496_v23, %v495_v22  ;;  %v4215_v34 = vpack.c.bf16 %v498_v32, %v497_v31  ;;  %v3784_v56 = vunpack.c.h.bf16 %v3900_v51  ;;  %v443_v57 = vmul.f32 %v4187_v9, %v3783_v55 }
  0x24   : > { %v4224_v44 = vpack.c.bf16 %v500_v42, %v499_v41  ;;  %v502_v53 = vmax.f32 %v470_v50, 0.0  ;;  %v3767_v59 = vunpack.c.l.bf16 %v3896_v54  ;;  %v3768_v60 = vunpack.c.h.bf16 %v3896_v54  ;;  %v3903_v54 = vld [vmem:[%s4182_s30 + $0x58] sm:$0xff]   ;;  %p4007_p13 = pneg %p4006_p12 }
  0x25   : > { %3290 = vmatmul.msk.bf16.vlgmr.msra.gmra.mxu1 %vm591_vm0, %v4206_v26  ;;  %v444_v58 = vmul.f32 %v4187_v9, %v3784_v56  ;;  %v479_v62 = vadd.f32 %v4199_v15, %v443_v57  ;;  %v3787_v11 = vunpack.c.l.bf16 %v3901_v10  ;;  %v3788_v12 = vunpack.c.h.bf16 %v3901_v10  ;;  %v3899_v57 = vld [vmem:[%s4182_s30 + $0x38] sm:$0xff]  }
  0x26   : > { %v4236_v61 = vpack.c.bf16 %v502_v53, %v501_v52  ;;  %v435_v2 = vmul.f32 %v4187_v9, %v3767_v59  ;;  %v436_v3 = vmul.f32 %v4187_v9, %v3768_v60  ;;  %v3771_v18 = vunpack.c.l.bf16 %v3897_v13  ;;  %p4012_p3 = pnand %p4011_p2, %p4007_p13 }
  0x27   : > { %v480_v63 = vadd.f32 %v4199_v15, %v444_v58  ;;  %v511_v0 = vmax.f32 %v479_v62, 0.0  ;;  %v445_v14 = vmul.f32 %v4187_v9, %v3787_v11  ;;  %v446_v16 = vmul.f32 %v4187_v9, %v3788_v12  ;;  %v3904_v11 = vld [vmem:[%s4182_s30 + $0x60] sm:$0xff]  }
  0x28   : > { %v471_v5 = vadd.f32 %v4199_v15, %v435_v2  ;;  %v472_v6 = vadd.f32 %v4199_v15, %v436_v3  ;;  %v3772_v19 = vunpack.c.h.bf16 %v3897_v13  ;;  %v437_v24 = vmul.f32 %v4187_v9, %v3771_v18  ;;  %v3268_v18 = vld [vmem:[%s5552_s3 + $0x30] sm:$0xf] }
  0x29   : > { %v512_v1 = vmax.f32 %v480_v63, 0.0  ;;  %v481_v20 = vadd.f32 %v4199_v15, %v445_v14  ;;  %v482_v21 = vadd.f32 %v4199_v15, %v446_v16  ;;  %v3791_v35 = vunpack.c.l.bf16 %v3902_v30 }
  0x2a   : > { %v503_v7 = vmax.f32 %v471_v5, 0.0  ;;  %v504_v8 = vmax.f32 %v472_v6, 0.0  ;;  %v438_v25 = vmul.f32 %v4187_v9, %v3772_v19  ;;  %v473_v28 = vadd.f32 %v4199_v15, %v437_v24  ;;  %v3679_v19 = vld [vmem:[%s5552_s3 + $0x34] sm:$0xf0] }
  0x2b   : > { %v4244_v4 = vpack.c.bf16 %v512_v1, %v511_v0  ;;  %v513_v22 = vmax.f32 %v481_v20, 0.0  ;;  %v514_v23 = vmax.f32 %v482_v21, 0.0  ;;  %v3792_v36 = vunpack.c.h.bf16 %v3902_v30 }
  0x2c   : > { %v4254_v17 = vpack.c.bf16 %v504_v8, %v503_v7  ;;  %v474_v29 = vadd.f32 %v4199_v15, %v438_v25  ;;  %v505_v31 = vmax.f32 %v473_v28, 0.0  ;;  %v447_v37 = vmul.f32 %v4187_v9, %v3791_v35  ;;  %v3260_v28 = vld [vmem:[%s5552_s3 + $0x20] sm:$0xf]  ;;  %v3252_v35 = vld [vmem:[%s5552_s3 + $0x10] sm:$0xf] }
  0x2d   : > { %3298 = vmatmul.msk.bf16.vlgmr.msra.gmra.mxu3 %vm591_vm0, %v4244_v4  ;;  %v4262_v27 = vpack.c.bf16 %v514_v23, %v513_v22  ;;  %v448_v38 = vmul.f32 %v4187_v9, %v3792_v36  ;;  %v3775_v39 = vunpack.c.l.bf16 %v3898_v33  ;;  %v3776_v40 = vunpack.c.h.bf16 %v3898_v33  ;;  %v3675_v36 = vld [vmem:[%s5552_s3 + $0x14] sm:$0xf0] }
  0x2e   : > { %v506_v32 = vmax.f32 %v474_v29, 0.0  ;;  %v483_v42 = vadd.f32 %v4199_v15, %v447_v37  ;;  %v3795_v55 = vunpack.c.l.bf16 %v3903_v54  ;;  %v3796_v56 = vunpack.c.h.bf16 %v3903_v54  ;;  %v3677_v29 = vld [vmem:[%s5552_s3 + $0x24] sm:$0xf0] }
  0x2f   : > { %v484_v43 = vadd.f32 %v4199_v15, %v448_v38  ;;  %v439_v47 = vmul.f32 %v4187_v9, %v3775_v39  ;;  %v440_v48 = vmul.f32 %v4187_v9, %v3776_v40  ;;  %v3779_v62 = vunpack.c.l.bf16 %v3899_v57  ;;  %v3244_v38 = vld [vmem:[%s5552_s3] sm:$0xf]  ;;  %v3673_v39 = vld [vmem:[%s5552_s3 + $0x4] sm:$0xf0] }
  0x30   : > { %v4272_v41 = vpack.c.bf16 %v506_v32, %v505_v31  ;;  %v515_v45 = vmax.f32 %v483_v42, 0.0  ;;  %v449_v58 = vmul.f32 %v4187_v9, %v3795_v55  ;;  %v450_v59 = vmul.f32 %v4187_v9, %v3796_v56  ;;  %v3905_v42 = vld [vmem:[%s4182_s30 + $0x68] sm:$0xff]  }
  0x31   : > { %v516_v46 = vmax.f32 %v484_v43, 0.0  ;;  %v475_v50 = vadd.f32 %v4199_v15, %v439_v47  ;;  %v476_v51 = vadd.f32 %v4199_v15, %v440_v48  ;;  %v3780_v63 = vunpack.c.h.bf16 %v3899_v57 }
  0x32   : > { %v485_v0 = vadd.f32 %v4199_v15, %v449_v58  ;;  %v486_v1 = vadd.f32 %v4199_v15, %v450_v59  ;;  %v441_v5 = vmul.f32 %v4187_v9, %v3779_v62  ;;  %v3799_v14 = vunpack.c.l.bf16 %v3904_v11 }
  0x33   : > { %v4280_v49 = vpack.c.bf16 %v516_v46, %v515_v45  ;;  %v507_v52 = vmax.f32 %v475_v50, 0.0  ;;  %v508_v53 = vmax.f32 %v476_v51, 0.0  ;;  %v442_v6 = vmul.f32 %v4187_v9, %v3780_v63  ;;  %v4345_v46 = vld [vmem:[%s5553_s4] ss:$0 sm:$0xff] }
  0x34   : > { %v517_v2 = vmax.f32 %v485_v0, 0.0  ;;  %v518_v3 = vmax.f32 %v486_v1, 0.0  ;;  %v477_v8 = vadd.f32 %v4199_v15, %v441_v5  ;;  %v3800_v16 = vunpack.c.h.bf16 %v3904_v11  ;;  %v4354_v50 = vld [vmem:[%s5554_s5] ss:$0 sm:$0xff]  ;;  %v3906_v5 = vld [vmem:[%s4182_s30 + $0x70] sm:$0xff]   ;;  %v3701_v11 = vld [vmem:[%s5555_s6 + $0x28] sm:$0xff] }
  0x35   : > { %3291 = vmatmul.msk.bf16.gmra.mxu1 %vm591_vm0, %v4215_v34  ;;  %v4290_v60 = vpack.c.bf16 %v508_v53, %v507_v52  ;;  %v478_v10 = vadd.f32 %v4199_v15, %v442_v6  ;;  %v3269_v20 = vor.u32 %v3679_v19, %v3268_v18  ;;  %v451_v21 = vmul.f32 %v4187_v9, %v3799_v14 }
  0x36   : > { %v4298_v7 = vpack.c.bf16 %v518_v3, %v517_v2  ;;  %v509_v12 = vmax.f32 %v477_v8, 0.0  ;;  %v452_v22 = vmul.f32 %v4187_v9, %v3800_v16  ;;  %v3261_v30 = vor.u32 %v3677_v29, %v3260_v28  ;;  %v4377_v3 = vld [vmem:[%s5555_s6 + $0x88] sm:$0xff]  ;;  %2401 = vmatpush.bf16.msrb.mxu3 %v3701_v11 }
  0x37   : > { %v510_v13 = vmax.f32 %v478_v10, 0.0  ;;  %644 = vmatpush.bf16.msra.mxu0 %v3269_v20  ;;  %v487_v24 = vadd.f32 %v4199_v15, %v451_v21  ;;  %3923 = vmatpush.bf16.msra.mxu2 %v3269_v20  ;;  %v3253_v37 = vor.u32 %v3675_v36, %v3252_v35  ;;  %v3245_v40 = vor.u32 %v3673_v39, %v3244_v38 }
  0x38   : > { %v488_v25 = vadd.f32 %v4199_v15, %v452_v22  ;;  %v3803_v43 = vunpack.c.l.bf16 %v3905_v42  ;;  %v3804_v45 = vunpack.c.h.bf16 %v3905_v42  ;;  %v3807_v6 = vunpack.c.l.bf16 %v3906_v5 }
  0x39   : > { %v4313_v23 = vpack.c.bf16 %v510_v13, %v509_v12  ;;  %v519_v31 = vmax.f32 %v487_v24, 0.0  ;;  %v3808_v8 = vunpack.c.h.bf16 %v3906_v5  ;;  %vm1835_vm1 = vcmask 781827  }
  0x3a   : > { %v520_v32 = vmax.f32 %v488_v25, 0.0  ;;  %v453_v47 = vmul.f32 %v4187_v9, %v3803_v43  ;;  %v454_v48 = vmul.f32 %v4187_v9, %v3804_v45  ;;  %v455_v13 = vmul.f32 %v4187_v9, %v3807_v6 }
  0x3b   : > { %645 = vmatpush.bf16.msra.mxu0 %v3261_v30  ;;  %3924 = vmatpush.bf16.msra.mxu2 %v3261_v30  ;;  %v456_v14 = vmul.f32 %v4187_v9, %v3808_v8 }
  0x3c   : > { %v4325_v33 = vpack.c.bf16 %v520_v32, %v519_v31  ;;  %v489_v51 = vadd.f32 %v4199_v15, %v453_v47  ;;  %v490_v52 = vadd.f32 %v4199_v15, %v454_v48  ;;  %v491_v19 = vadd.f32 %v4199_v15, %v455_v13 }
  0x3d   : > { %3299 = vmatmul.msk.bf16.gmra.mxu3 %vm591_vm0, %v4262_v27  ;;  %v492_v20 = vadd.f32 %v4199_v15, %v456_v14 }
  0x3e   : > { %v521_v55 = vmax.f32 %v489_v51, 0.0  ;;  %v522_v56 = vmax.f32 %v490_v52, 0.0  ;;  %v523_v24 = vmax.f32 %v491_v19, 0.0 }
  0x3f   : > { %646 = vmatpush.bf16.msra.mxu0 %v3253_v37  ;;  %3925 = vmatpush.bf16.msra.mxu2 %v3253_v37  ;;  %v524_v25 = vmax.f32 %v492_v20, 0.0 }
  0x40   : > { %v4362_v57 = vpack.c.bf16 %v522_v56, %v521_v55 }
  0x41   : > { %v4399_v31 = vpack.c.bf16 %v524_v25, %v523_v24 }
  0x43   : > { %647 = vmatpush.bf16.msra.mxu0 %v3245_v40  ;;  %3926 = vmatpush.bf16.msra.mxu2 %v3245_v40 }
  0x45   : > { %3292 = vmatmul.msk.bf16.gmra.mxu1 %vm591_vm0, %v4224_v44 }
  0x46   : > { %3274 = vmatmul.msk.bf16.vlgmr.msra.gmra.mxu0 %vm591_vm0, %v4206_v26  ;;  %3283 = vmatmul.msk.bf16.vlgmr.msra.gmra.mxu2 %vm591_vm0, %v4262_v27 }
  0x47   : > { %2700 = vmatpush.bf16.msrb.mxu0 %v4377_v3 }
  0x4d   : > { %3300 = vmatmul.msk.bf16.gmra.mxu3 %vm591_vm0, %v4280_v49 }
  0x55   : > { %3293 = vmatmul.msk.bf16.gmra.mxu1 %vm591_vm0, %v4236_v61 }
  0x56   : > { %3275 = vmatmul.msk.bf16.gmra.mxu0 %vm591_vm0, %v4215_v34  ;;  %3284 = vmatmul.msk.bf16.gmra.mxu2 %vm591_vm0, %v4280_v49 }
  0x5d   : > { %3301 = vmatmul.msk.bf16.gmra.mxu3 %vm591_vm0, %v4298_v7 }
  0x65   : > { %3294 = vmatmul.msk.bf16.gmra.mxu1 %vm591_vm0, %v4254_v17 }
  0x66   : > { %3276 = vmatmul.msk.bf16.gmra.mxu0 %vm591_vm0, %v4224_v44  ;;  %3285 = vmatmul.msk.bf16.gmra.mxu2 %vm591_vm0, %v4298_v7 }
  0x6d   : > { %3302 = vmatmul.msk.bf16.gmra.mxu3 %vm591_vm0, %v4325_v33 }
  0x75   : > { %3295 = vmatmul.msk.bf16.gmra.mxu1 %vm591_vm0, %v4272_v41 }
  0x76   : > { %3277 = vmatmul.msk.bf16.gmra.mxu0 %vm591_vm0, %v4236_v61  ;;  %3286 = vmatmul.msk.bf16.gmra.mxu2 %vm591_vm0, %v4325_v33 }
  0x7d   : > { %3303 = vmatmul.msk.bf16.gmra.mxu3 %vm591_vm0, %v4362_v57 }
  0x85   : > { %3296 = vmatmul.msk.bf16.gmra.mxu1 %vm591_vm0, %v4290_v60 }
  0x86   : > { %3278 = vmatmul.msk.bf16.gmra.mxu0 %vm591_vm0, %v4254_v17  ;;  %3287 = vmatmul.msk.bf16.gmra.mxu2 %vm591_vm0, %v4362_v57 }
  0x8d   : > { %3304 = vmatmul.msk.bf16.gmra.mxu3 %vm591_vm0, %v4399_v31 }
  0x95   : > { %3297 = vmatmul.msk.bf16.gmra.mxu1 %vm591_vm0, %v4313_v23 }
  0x96   : > { %3279 = vmatmul.msk.bf16.gmra.mxu0 %vm591_vm0, %v4272_v41  ;;  %3288 = vmatmul.msk.bf16.gmra.mxu2 %vm591_vm0, %v4399_v31 }
  0xa2   : > { %v738_v53 = vpop.f32.mrf.mxu1 }
  0xa3   : > { %v822_v54 = vmul.f32 %v4345_v46, %v738_v53  ;;  %v3723_v53 = vld [vmem:[%s5555_s6 + $0x58] sm:$0xff] }
  0xa4   : > { %2148 = vmatpush.bf16.msrb.mxu2 %v3723_v53 }
  0xa5   : > { %v858_v26 = vadd.f32 %v4354_v50, %v822_v54  ;;  %v3907_v54 = vld [vmem:[%s4182_s30 + $0x78] sm:$0xff]   ;;  %s3170_s30 = sshll.u32 %s5434_s21, 4  ;;  %s3171_s30 = int_to_ptr.vmem [resolvable:$true] %s3170_s30 }
  0xa6   : > { %v3811_v55 = vunpack.c.l.bf16 %v3907_v54  ;;  %v3812_v56 = vunpack.c.h.bf16 %v3907_v54  ;;  %3280 = vmatmul.msk.bf16.gmra.mxu0 %vm591_vm0, %v4290_v60 }
  0xa7   : > { %v890_v58 = vmax.f32 %v858_v26, 0.0 }
  0xa9   : > { %v4366_v59 = vpack.c.bf16 %v890_v58, %v890_v58  ;;  %v4423_v58 = vld [vmem:[%s5555_s6 + $0x80] sm:$0xff] }
  0xaa   : > { %v740_v62 = vpop.f32.mrf.mxu1  ;;  %2701 = vmatpush.bf16.msrb.mxu0 %v4423_v58 }
  0xab   : > { %v1120_v63 = vshrl.u32 %v4366_v59, 16  ;;  %v823_v27 = vmul.f32 %v4345_v46, %v740_v62  ;;  %986 = vrot.lane.b32.xlu0 %v4366_v59, %s4052_s28  ;;  %v1123_v1 = vshll.u32 %v4366_v59, 16 }
  0xad   : > { %v1122_v0 = vrot.slane %v1120_v63, 7  ;;  %v859_v2 = vadd.f32 %v4354_v50, %v823_v27  ;;  %v1528_v62 = vrot.slane %v1120_v63, 4  ;;  %v1529_v27 = vrot.slane %v1123_v1, 5 }
  0xaf   : > { %v891_v10 = vmax.f32 %v859_v2, 0.0  ;;  %v4384_v12 = vor.u32 %v1123_v1, %v1122_v0  ;;  %v1126_v38 = vrot.slane %v1122_v0, 4  ;;  %v457_v0 = vmul.f32 %v4187_v9, %v3811_v55 }
  0xb0   : > { %v458_v2 = vmul.f32 %v4187_v9, %v3812_v56  ;;  %v1530_v1 = vor.u32 %v1529_v27, %v1528_v62 }
  0xb1   : > { %v923_v16 = vpack.c.bf16 %v891_v10, %v891_v10  ;;  %v493_v8 = vadd.f32 %v4199_v15, %v457_v0 }
  0xb2   : > { %v743_v18 = vpop.f32.mrf.mxu1  ;;  %v494_v10 = vadd.f32 %v4199_v15, %v458_v2  ;;  %v1531_v24 = vrot.slane %v1530_v1, 4 }
  0xb3   : > { %v824_v21 = vmul.f32 %v4345_v46, %v743_v18  ;;  %988 = vrot.lane.b32.xlu0 %v923_v16, %s4052_s28  ;;  %v1128_v34 = vshrl.u32 %v923_v16, 16  ;;  %v1131_v22 = vshll.u32 %v923_v16, 16  ;;  %v525_v11 = vmax.f32 %v493_v8, 0.0 }
  0xb4   : > { %v526_v13 = vmax.f32 %v494_v10, 0.0 }
  0xb5   : > { %v860_v28 = vadd.f32 %v4354_v50, %v824_v21  ;;  %v4397_v29 = vrot.slane %v1131_v22, 5  ;;  %v1534_v49 = vrot.slane %v1128_v34, 4  ;;  %v1130_v30 = vrot.slane %v1128_v34, 7 }
  0xb6   : > { %v4440_v19 = vpack.c.bf16 %v526_v13, %v525_v11  ;;  %3281 = vmatmul.msk.bf16.gmra.mxu0 %vm591_vm0, %v4313_v23 }
  0xb7   : > { %v892_v35 = vmax.f32 %v860_v28, 0.0  ;;  %v1535_v36 = vor.u32 %v1534_v49, %v4397_v29  ;;  %v1133_v37 = vor.u32 %v1131_v22, %v1130_v30 }
  0xb8   : > { %3305 = vmatmul.msk.bf16.gmra.mxu3 %vm591_vm0, %v4440_v19  ;;  %3289 = vmatmul.msk.bf16.gmra.mxu2 %vm591_vm0, %v4440_v19 }
  0xb9   : > { %v924_v39 = vpack.c.bf16 %v892_v35, %v892_v35  ;;  %v1536_v40 = vrot.slane %v1535_v36, 4  ;;  %v4411_v42 = vsel %vm4402_vm3, %v1126_v38, %v1133_v37  ;;  %v1533_v37 = vsel %vm4443_vm6, %v1531_v24, %v4397_v29  ;;  %v3700_v29 = vld [vmem:[%s5555_s6 + $0x20] sm:$0xff]  ;;  %v4495_v24 = vld [vmem:[%s5555_s6 + $0x78] sm:$0xff] }
  0xba   : > { %v745_v43 = vpop.f32.mrf.mxu1  ;;  %2402 = vmatpush.bf16.msrb.mxu3 %v3700_v29  ;;  %2702 = vmatpush.bf16.msrb.mxu0 %v4495_v24 }
  0xbb   : > { %v1136_v45 = vshrl.u32 %v924_v39, 16  ;;  %v825_v47 = vmul.f32 %v4345_v46, %v745_v43  ;;  %1674 = vrot.lane.b32.xlu1 %v1536_v40, %s5560_s20  ;;  %v1139_v51 = vshll.u32 %v924_v39, 16 }
  0xbd   : > { %v1138_v48 = vrot.slane %v1136_v45, 7  ;;  %v861_v52 = vadd.f32 %v4354_v50, %v825_v47  ;;  %v1537_v25 = vrot.slane %v1136_v45, 4  ;;  %v1538_v28 = vrot.slane %v1139_v51, 5 }
  0xbf   : > { %v893_v26 = vmax.f32 %v861_v52, 0.0  ;;  %v4425_v59 = vor.u32 %v1139_v51, %v1138_v48  ;;  %v1142_v34 = vrot.slane %v1138_v48, 4  ;;  %v1539_v40 = vor.u32 %v1538_v28, %v1537_v25  ;;  %v3722_v48 = vld [vmem:[%s5555_s6 + $0x50] sm:$0xff]  ;;  %v3699_v28 = vld [vmem:[%s5555_s6 + $0x18] sm:$0xff] }
  0xc0   : > { %2149 = vmatpush.bf16.msrb.mxu2 %v3722_v48  ;;  %2403 = vmatpush.bf16.msrb.mxu3 %v3699_v28 }
  0xc1   : > { %v925_v5 = vpack.c.bf16 %v893_v26, %v893_v26  ;;  %v1540_v53 = vrot.slane %v1539_v40, 4 }
  0xc2   : > { %v748_v6 = vpop.f32.mrf.mxu1 }
  0xc3   : > { %v826_v63 = vmul.f32 %v4345_v46, %v748_v6  ;;  %990 = vrot.lane.b32.xlu1 %v924_v39, %s4052_s28  ;;  %992 = vrot.lane.b32.xlu2 %v925_v5, %s4052_s28  ;;  %v1144_v44 = vshrl.u32 %v925_v5, 16  ;;  %v1147_v9 = vshll.u32 %v925_v5, 16 }
  0xc5   : > { %v862_v7 = vadd.f32 %v4354_v50, %v826_v63  ;;  %v1541_v14 = vrot.slane %v1147_v9, 5  ;;  %v1543_v16 = vrot.slane %v1144_v44, 4  ;;  %v1146_v18 = vrot.slane %v1144_v44, 7 }
  0xc6   : > { %3282 = vmatmul.msk.bf16.gmra.mxu0 %vm591_vm0, %v4244_v4  ;;  %vm4783_vm0 = vmand %vm1768_vm14, %vm1525_vm4 }
  0xc7   : > { %v894_v15 = vmax.f32 %v862_v7, 0.0  ;;  %v1544_v21 = vor.u32 %v1543_v16, %v1541_v14  ;;  %v1149_v22 = vor.u32 %v1147_v9, %v1146_v18  ;;  %v1542_v56 = vsel %vm4443_vm6, %v1540_v53, %v1541_v14  ;;  %v4486_v16 = vpop.f32.mrf.mxu3  ;;  %vm4839_vm4 = vmand %vm1835_vm1, %vm1836_vm2 }
  0xc9   : > { %v926_v49 = vpack.c.bf16 %v894_v15, %v894_v15  ;;  %v1545_v30 = vrot.slane %v1544_v21, 4  ;;  %v4451_v35 = vsel %vm4402_vm3, %v1142_v34, %v1149_v22  ;;  %v3721_v22 = vld [vmem:[%s5555_s6 + $0x48] sm:$0xff] }
  0xca   : > { %v750_v36 = vpop.f32.mrf.mxu1  ;;  %2150 = vmatpush.bf16.msrb.mxu2 %v3721_v22 }
  0xcb   : > { %v1152_v38 = vshrl.u32 %v926_v49, 16  ;;  %v827_v39 = vmul.f32 %v4345_v46, %v750_v36  ;;  %1672 = vrot.lane.b32.xlu2 %v1533_v37, %s5560_s20  ;;  %1678 = vrot.lane.b32.xlu0 %v1545_v30, %s5560_s20  ;;  %v1155_v45 = vshll.u32 %v926_v49, 16 }
  0xcc   : > { %994 = vrot.lane.b32.xlu1 %v926_v49, %s4052_s28 }
  0xcd   : > { %v1154_v43 = vrot.slane %v1152_v38, 7  ;;  %v863_v47 = vadd.f32 %v4354_v50, %v827_v39  ;;  %v1546_v63 = vrot.slane %v1152_v38, 4  ;;  %v1547_v44 = vrot.slane %v1155_v45, 5 }
  0xcf   : > { %v895_v51 = vmax.f32 %v863_v47, 0.0  ;;  %v4467_v52 = vor.u32 %v1155_v45, %v1154_v43  ;;  %v1158_v33 = vrot.slane %v1154_v43, 4  ;;  %v1548_v18 = vor.u32 %v1547_v44, %v1546_v63  ;;  %v4512_v45 = vpop.f32.mrf.mxu3  ;;  %v3720_v44 = vld [vmem:[%s5555_s6 + $0x40] sm:$0xff] }
  0xd0   : > { %2151 = vmatpush.bf16.msrb.mxu2 %v3720_v44 }
  0xd1   : > { %v927_v54 = vpack.c.bf16 %v895_v51, %v895_v51  ;;  %v1549_v30 = vrot.slane %v1548_v18, 4 }
  0xd2   : > { %v753_v55 = vpop.f32.mrf.mxu1 }
  0xd3   : > { %v828_v26 = vmul.f32 %v4345_v46, %v753_v55  ;;  %1676 = vrot.lane.b32.xlu0 %v1542_v56, %s5560_s20  ;;  %996 = vrot.lane.b32.xlu2 %v927_v54, %s4052_s28  ;;  %v1160_v62 = vshrl.u32 %v927_v54, 16  ;;  %v1163_v27 = vshll.u32 %v927_v54, 16 }
  0xd5   : > { %v864_v0 = vadd.f32 %v4354_v50, %v828_v26  ;;  %v1550_v2 = vrot.slane %v1163_v27, 5  ;;  %v1552_v61 = vrot.slane %v1160_v62, 4  ;;  %v1162_v5 = vrot.slane %v1160_v62, 7 }
  0xd7   : > { %v896_v6 = vmax.f32 %v864_v0, 0.0  ;;  %v1553_v8 = vor.u32 %v1552_v61, %v1550_v2  ;;  %v1165_v10 = vor.u32 %v1163_v27, %v1162_v5  ;;  %v1551_v38 = vsel %vm4443_vm6, %v1549_v30, %v1550_v2  ;;  %v4522_v5 = vpop.f32.mrf.mxu3 }
  0xd9   : > { %v928_v9 = vpack.c.bf16 %v896_v6, %v896_v6  ;;  %v1554_v1 = vrot.slane %v1553_v8, 4  ;;  %v4481_v11 = vsel %vm4402_vm3, %v1158_v33, %v1165_v10 }
  0xda   : > { %v755_v13 = vpop.f32.mrf.mxu1 }
  0xdb   : > { %v1168_v7 = vshrl.u32 %v928_v9, 16  ;;  %v829_v14 = vmul.f32 %v4345_v46, %v755_v13  ;;  %1682 = vrot.lane.b32.xlu1 %v1554_v1, %s5560_s20  ;;  %998 = vrot.lane.b32.xlu2 %v928_v9, %s4052_s28  ;;  %v1171_v21 = vshll.u32 %v928_v9, 16  ;;  %v3698_v9 = vld [vmem:[%s5555_s6 + $0x10] sm:$0xff] }
  0xdc   : > { %v4534_v1 = vld [vmem:[%s5555_s6 + $0x70] sm:$0xff]  ;;  %2404 = vmatpush.bf16.msrb.mxu3 %v3698_v9 }
  0xdd   : > { %v1170_v15 = vrot.slane %v1168_v7, 7  ;;  %v865_v34 = vadd.f32 %v4354_v50, %v829_v14  ;;  %v1555_v55 = vrot.slane %v1168_v7, 4  ;;  %v1556_v56 = vrot.slane %v1171_v21, 5  ;;  %2703 = vmatpush.bf16.msrb.mxu0 %v4534_v1 }
  0xdf   : > { %v897_v25 = vmax.f32 %v865_v34, 0.0  ;;  %v4501_v49 = vor.u32 %v1171_v21, %v1170_v15  ;;  %v1174_v53 = vrot.slane %v1170_v15, 4  ;;  %v1557_v6 = vor.u32 %v1556_v56, %v1555_v55  ;;  %v4548_v22 = vpop.f32.mrf.mxu3 }
  0xe1   : > { %v929_v36 = vpack.c.bf16 %v897_v25, %v897_v25  ;;  %v1558_v7 = vrot.slane %v1557_v6, 4 }
  0xe2   : > { %v758_v37 = vpop.f32.mrf.mxu1 }
  0xe3   : > { %v830_v39 = vmul.f32 %v4345_v46, %v758_v37  ;;  %1680 = vrot.lane.b32.xlu1 %v1551_v38, %s5560_s20  ;;  %1000 = vrot.lane.b32.xlu0 %v929_v36, %s4052_s28  ;;  %v1176_v40 = vshrl.u32 %v929_v36, 16  ;;  %v1179_v43 = vshll.u32 %v929_v36, 16 }
  0xe5   : > { %v866_v17 = vadd.f32 %v4354_v50, %v830_v39  ;;  %v1559_v47 = vrot.slane %v1179_v43, 5  ;;  %v1561_v48 = vrot.slane %v1176_v40, 4  ;;  %v1178_v29 = vrot.slane %v1176_v40, 7 }
  0xe7   : > { %v898_v57 = vmax.f32 %v866_v17, 0.0  ;;  %v1562_v51 = vor.u32 %v1561_v48, %v1559_v47  ;;  %v1181_v54 = vor.u32 %v1179_v43, %v1178_v29  ;;  %v1560_v15 = vsel %vm4443_vm6, %v1558_v7, %v1559_v47 }
  0xe9   : > { %v930_v26 = vpack.c.bf16 %v898_v57, %v898_v57  ;;  %v1563_v62 = vrot.slane %v1562_v51, 4  ;;  %v4517_v27 = vsel %vm4402_vm3, %v1174_v53, %v1181_v54  ;;  %v4558_v53 = vpop.f32.mrf.mxu3 }
  0xea   : > { %v760_v0 = vpop.f32.mrf.mxu1 }
  0xeb   : > { %v1184_v2 = vshrl.u32 %v930_v26, 16  ;;  %v831_v61 = vmul.f32 %v4345_v46, %v760_v0  ;;  %1686 = vrot.lane.b32.xlu2 %v1563_v62, %s5560_s20  ;;  %1002 = vrot.lane.b32.xlu0 %v930_v26, %s4052_s28  ;;  %v1187_v33 = vshll.u32 %v930_v26, 16  ;;  %v838_v26 = vmul.f32 %v4345_v46, %v4486_v16 }
  0xec   : > { %v839_v62 = vmul.f32 %v4345_v46, %v4512_v45 }
  0xed   : > { %v1186_v8 = vrot.slane %v1184_v2, 7  ;;  %v867_v10 = vadd.f32 %v4354_v50, %v831_v61  ;;  %v1564_v31 = vrot.slane %v1184_v2, 4  ;;  %v1565_v43 = vrot.slane %v1187_v33, 5 }
  0xef   : > { %v899_v63 = vmax.f32 %v867_v10, 0.0  ;;  %v4536_v13 = vor.u32 %v1187_v33, %v1186_v8  ;;  %v1190_v39 = vrot.slane %v1186_v8, 4  ;;  %v1566_v54 = vor.u32 %v1565_v43, %v1564_v31 }
  0xf0   : > { %v874_v33 = vadd.f32 %v4354_v50, %v838_v26 }
  0xf1   : > { %v931_v14 = vpack.c.bf16 %v899_v63, %v899_v63  ;;  %v1567_v61 = vrot.slane %v1566_v54, 4  ;;  %v875_v63 = vadd.f32 %v4354_v50, %v839_v62  ;;  %v4578_v9 = vpop.f32.mrf.mxu3 }
  0xf2   : > { %v763_v18 = vpop.f32.mrf.mxu1 }
  0xf3   : > { %v832_v21 = vmul.f32 %v4345_v46, %v763_v18  ;;  %1684 = vrot.lane.b32.xlu2 %v1560_v15, %s5560_s20  ;;  %1004 = vrot.lane.b32.xlu1 %v931_v14, %s4052_s28  ;;  %v1192_v34 = vshrl.u32 %v931_v14, 16  ;;  %v1195_v41 = vshll.u32 %v931_v14, 16 }
  0xf5   : > { %v868_v25 = vadd.f32 %v4354_v50, %v832_v21  ;;  %v1568_v28 = vrot.slane %v1195_v41, 5  ;;  %v1570_v30 = vrot.slane %v1192_v34, 4  ;;  %v1194_v36 = vrot.slane %v1192_v34, 7 }
  0xf6   : > { %v906_v21 = vmax.f32 %v874_v33, 0.0  ;;  %v907_v34 = vmax.f32 %v875_v63, 0.0 }
  0xf7   : > { %v900_v37 = vmax.f32 %v868_v25, 0.0  ;;  %v1571_v38 = vor.u32 %v1570_v30, %v1568_v28  ;;  %v1197_v40 = vor.u32 %v1195_v41, %v1194_v36  ;;  %v1569_v16 = vsel %vm4443_vm6, %v1567_v61, %v1568_v28 }
  0xf8   : > { %v840_v30 = vmul.f32 %v4345_v46, %v4522_v5  ;;  %v4589_v31 = vpack.c.bf16 %v906_v21, %v906_v21 }
  0xf9   : > { %v932_v17 = vpack.c.bf16 %v900_v37, %v900_v37  ;;  %v1572_v47 = vrot.slane %v1571_v38, 4  ;;  %v4553_v48 = vsel %vm4402_vm3, %v1190_v39, %v1197_v40 }
  0xfa   : > { %v765_v29 = vpop.f32.mrf.mxu1  ;;  %v876_v54 = vadd.f32 %v4354_v50, %v840_v30 }
  0xfb   : > { %v1200_v57 = vshrl.u32 %v932_v17, 16  ;;  %v833_v51 = vmul.f32 %v4345_v46, %v765_v29  ;;  %1690 = vrot.lane.b32.xlu0 %v1572_v47, %s5560_s20  ;;  %1006 = vrot.lane.b32.xlu1 %v932_v17, %s4052_s28  ;;  %v1203_v0 = vshll.u32 %v932_v17, 16  ;;  %v3697_v17 = vld [vmem:[%s5555_s6 + $0x8] sm:$0xff]  ;;  %v4594_v47 = vpack.c.bf16 %v907_v34, %v907_v34 }
  0xfc   : > { %2405 = vmatpush.bf16.msrb.mxu3 %v3697_v17  ;;  %v908_v63 = vmax.f32 %v876_v54, 0.0  ;;  %v1251_v17 = vshll.u32 %v4589_v31, 16 }
  0xfd   : > { %v1202_v55 = vrot.slane %v1200_v57, 7  ;;  %v869_v56 = vadd.f32 %v4354_v50, %v833_v51  ;;  %v1573_v36 = vrot.slane %v1200_v57, 4  ;;  %v1574_v37 = vrot.slane %v1203_v0, 5  ;;  %v4601_v57 = vpop.f32.mrf.mxu3 }
  0xfe   : > { %v4054_v51 = vmov 0   ;;  %v1256_v61 = vshrl.u32 %v4594_v47, 16  ;;  %v1259_v34 = vshll.u32 %v4594_v47, 16 }
  0xff   : > { %v901_v2 = vmax.f32 %v869_v56, 0.0  ;;  %v4567_v8 = vor.u32 %v1203_v0, %v1202_v55  ;;  %v1206_v19 = vrot.slane %v1202_v55, 4  ;;  %1887 = vst.msk [vmem:[#allocation2] sm:$0xf] %vm1886_vm7, %v4054_v51  ;;  %v841_v55 = vmul.f32 %v4345_v46, %v4548_v22  ;;  %v3696_v22 = vld [vmem:[%s5555_s6] sm:$0xff] }
 0x100   : > { %v1575_v56 = vor.u32 %v1574_v37, %v1573_v36  ;;  %1888 = vst.msk [vmem:[#allocation2 + $0x4] sm:$0xf] %vm1886_vm7, %v4054_v51  ;;  %2406 = vmatpush.bf16.msrb.mxu3 %v3696_v22  ;;  %v1258_v21 = vrot.slane %v1256_v61, 7 }
 0x101   : > { %v933_v6 = vpack.c.bf16 %v901_v2, %v901_v2  ;;  %1890 = vst.msk [vmem:[#allocation2 + $0x88] sm:$0xf] %vm1886_vm7, %v4054_v51  ;;  %v1248_v2 = vshrl.u32 %v4589_v31, 16 }
 0x102   : > { %v768_v10 = vpop.f32.mrf.mxu1  ;;  %1891 = vst.msk [vmem:[#allocation2 + $0x8c] sm:$0xf] %vm1886_vm7, %v4054_v51  ;;  %v1261_v51 = vor.u32 %v1259_v34, %v1258_v21  ;;  %v3718_v21 = vld [vmem:[%s5555_s6 + $0x30] sm:$0xff] }
 0x103   : > { %v834_v45 = vmul.f32 %v4345_v46, %v768_v10  ;;  %1688 = vrot.lane.b32.xlu0 %v1569_v16, %s5560_s20  ;;  %1008 = vrot.lane.b32.xlu2 %v933_v6, %s4052_s28  ;;  %v1208_v60 = vshrl.u32 %v933_v6, 16  ;;  %v1211_v44 = vshll.u32 %v933_v6, 16  ;;  %v1250_v10 = vrot.slane %v1248_v2, 7 }
 0x104   : > { %v877_v16 = vadd.f32 %v4354_v50, %v841_v55 }
 0x105   : > { %v870_v7 = vadd.f32 %v4354_v50, %v834_v45  ;;  %v1577_v14 = vrot.slane %v1211_v44, 5  ;;  %v1579_v18 = vrot.slane %v1208_v60, 4  ;;  %v1210_v15 = vrot.slane %v1208_v60, 7  ;;  %v3719_v60 = vld [vmem:[%s5555_s6 + $0x38] sm:$0xff] }
 0x106   : > { %v1576_v45 = vrot.slane %v1575_v56, 4  ;;  %2152 = vmatpush.bf16.msrb.mxu2 %v3719_v60  ;;  %v909_v30 = vmax.f32 %v877_v16, 0.0  ;;  %v1254_v36 = vrot.slane %v1250_v10, 4 }
 0x107   : > { %v902_v41 = vmax.f32 %v870_v7, 0.0  ;;  %v1580_v25 = vor.u32 %v1579_v18, %v1577_v14  ;;  %v1213_v28 = vor.u32 %v1211_v44, %v1210_v15  ;;  %v4630_v7 = vld [vmem:[%s5555_s6 + $0x68] sm:$0xff] }
 0x108   : > { %v1578_v15 = vsel %vm4443_vm6, %v1576_v45, %v1577_v14  ;;  %2704 = vmatpush.bf16.msrb.mxu0 %v4630_v7  ;;  %v4643_v14 = vpop.f32.mrf.mxu3  ;;  %v4655_v16 = vsel %vm4402_vm3, %v1254_v36, %v1261_v51 }
 0x109   : > { %v4583_v38 = vpack.c.bf16 %v902_v41, %v902_v41  ;;  %v1581_v39 = vrot.slane %v1580_v25, 4  ;;  %v4587_v40 = vsel %vm4402_vm3, %v1206_v19, %v1213_v28  ;;  %v3680_v19 = vld [vmem:[#allocation2] sm:$0xff]  ;;  %v4640_v28 = vpack.c.bf16 %v908_v63, %v908_v63 }
 0x10a   : > { %v770_v43 = vpop.f32.mrf.mxu1  ;;  %3510 = vmatmul.msk.bf16.vlgmr.msrb.gmra.mxu3 %vm2097_vm8, %v3680_v19  ;;  %2153 = vmatpush.bf16.msrb.mxu2 %v3718_v21 }
 0x10b   : > { %v1216_v5 = vshrl.u32 %v4583_v38, 16  ;;  %v835_v29 = vmul.f32 %v4345_v46, %v770_v43  ;;  %1694 = vrot.lane.b32.xlu1 %v1581_v39, %s5560_s20  ;;  %1010 = vrot.lane.b32.xlu2 %v4583_v38, %s4052_s28  ;;  %v1219_v62 = vshll.u32 %v4583_v38, 16  ;;  %v1267_v51 = vshll.u32 %v4640_v28, 16 }
 0x10d   : > { %v1218_v26 = vrot.slane %v1216_v5, 7  ;;  %v871_v0 = vadd.f32 %v4354_v50, %v835_v29  ;;  %v1264_v29 = vshrl.u32 %v4640_v28, 16  ;;  %v1582_v22 = vrot.slane %v1216_v5, 4 }
 0x10e   : > { %v1583_v63 = vrot.slane %v1219_v62, 5  ;;  %3931 = vmatpush.bf16.msra.mxu2 %v4377_v3 }
 0x10f   : > { %v903_v6 = vmax.f32 %v871_v0, 0.0  ;;  %v4617_v33 = vor.u32 %v1219_v62, %v1218_v26  ;;  %v1222_v56 = vrot.slane %v1218_v26, 4  ;;  %v1266_v5 = vrot.slane %v1264_v29, 7 }
 0x111   : > { %v935_v44 = vpack.c.bf16 %v903_v6, %v903_v6  ;;  %v4651_v6 = vpack.c.bf16 %v909_v30, %v909_v30 }
 0x112   : > { %v773_v18 = vpop.f32.mrf.mxu1  ;;  %3932 = vmatpush.bf16.msra.mxu2 %v4423_v58  ;;  %v1606_v58 = vrot.slane %v1256_v61, 4 }
 0x113   : > { %v836_v41 = vmul.f32 %v4345_v46, %v773_v18  ;;  %1692 = vrot.lane.b32.xlu1 %v1578_v15, %s5560_s20  ;;  %1012 = vrot.lane.b32.xlu0 %v935_v44, %s4052_s28  ;;  %v1224_v23 = vshrl.u32 %v935_v44, 16  ;;  %v1227_v25 = vshll.u32 %v935_v44, 16  ;;  %v4665_v18 = vor.u32 %v1251_v17, %v1250_v10 }
 0x114   : > { %v842_v10 = vmul.f32 %v4345_v46, %v4558_v53  ;;  %v4689_v53 = vpop.f32.mrf.mxu3 }
 0x115   : > { %v872_v37 = vadd.f32 %v4354_v50, %v836_v41  ;;  %v1586_v38 = vrot.slane %v1227_v25, 5  ;;  %v1588_v39 = vrot.slane %v1224_v23, 4  ;;  %v1226_v43 = vrot.slane %v1224_v23, 7 }
 0x116   : > { %v1584_v41 = vor.u32 %v1583_v63, %v1582_v22  ;;  %v1272_v23 = vshrl.u32 %v4651_v6, 16  ;;  %v4706_v63 = vpop.f32.mrf.mxu0  ;;  %3933 = vmatpush.bf16.msra.mxu2 %v4495_v24 }
 0x117   : > { %v904_v54 = vmax.f32 %v872_v37, 0.0  ;;  %v1589_v55 = vor.u32 %v1588_v39, %v1586_v38  ;;  %v1229_v0 = vor.u32 %v1227_v25, %v1226_v43  ;;  %v843_v39 = vmul.f32 %v4345_v46, %v4578_v9 }
 0x118   : > { %v1274_v43 = vrot.slane %v1272_v23, 7  ;;  %v878_v9 = vadd.f32 %v4354_v50, %v842_v10 }
 0x119   : > { %v4657_v45 = vpack.c.bf16 %v904_v54, %v904_v54  ;;  %v1590_v60 = vrot.slane %v1589_v55, 4  ;;  %v4661_v44 = vsel %vm4402_vm3, %v1222_v56, %v1229_v0  ;;  %v1585_v56 = vrot.slane %v1584_v41, 4 }
 0x11a   : > { %v775_v26 = vpop.f32.mrf.mxu1  ;;  %v1275_v0 = vshll.u32 %v4651_v6, 16  ;;  %v879_v3 = vadd.f32 %v4354_v50, %v843_v39  ;;  %v910_v41 = vmax.f32 %v878_v9, 0.0  ;;  %3934 = vmatpush.bf16.msra.mxu2 %v4534_v1  ;;  %v844_v1 = vmul.f32 %v4345_v46, %v4601_v57 }
 0x11b   : > { %v1232_v62 = vshrl.u32 %v4657_v45, 16  ;;  %v837_v15 = vmul.f32 %v4345_v46, %v775_v26  ;;  %1698 = vrot.lane.b32.xlu2 %v1590_v60, %s5560_s20  ;;  %1014 = vrot.lane.b32.xlu0 %v4657_v45, %s4052_s28  ;;  %v1235_v19 = vshll.u32 %v4657_v45, 16  ;;  %v4710_v60 = vor.u32 %v1267_v51, %v1266_v5 }
 0x11c   : > { %v1587_v26 = vsel %vm4443_vm6, %v1585_v56, %v1586_v38  ;;  %v4726_v38 = vrot.slane %v1259_v34, 5  ;;  %v4742_v9 = vpack.c.bf16 %v910_v41, %v910_v41  ;;  %v845_v45 = vmul.f32 %v4345_v46, %v4643_v14 }
 0x11d   : > { %v4682_v25 = vrot.slane %v1232_v62, 7  ;;  %v873_v30 = vadd.f32 %v4354_v50, %v837_v15  ;;  %v987_v36 = vpop.permute.xlu0 %986  ;;  %v993_v37 = vpop.permute.xlu2 %992  ;;  %v1277_v15 = vor.u32 %v1275_v0, %v1274_v43  ;;  %v1591_v24 = vrot.slane %v1232_v62, 4 }
 0x11e   : > { %1084 = vst.msk [vmem:[#allocation2 + $0x8] sm:$0xf] %vm1083_vm9, %v987_v36  ;;  %v911_v36 = vmax.f32 %v879_v3, 0.0  ;;  %v1607_v3 = vor.u32 %v1606_v58, %v4726_v38  ;;  %v1280_v41 = vshrl.u32 %v4742_v9, 16  ;;  %3935 = vmatpush.bf16.msra.mxu2 %v4630_v7  ;;  %v1283_v7 = vshll.u32 %v4742_v9, 16 }
 0x11f   : > { %v905_v54 = vmax.f32 %v873_v30, 0.0  ;;  %1087 = vst.msk [vmem:[#allocation2 + $0x14] sm:$0xf] %vm1083_vm9, %v993_v37  ;;  %v4697_v55 = vor.u32 %v1235_v19, %v4682_v25 }
 0x120   : > { %1418 = vst.msk [vmem:[#allocation2 + $0x14] sm:$0xf] %vm1407_vm10, %v4451_v35  ;;  %v1270_v35 = vrot.slane %v1266_v5, 4  ;;  %v1282_v62 = vrot.slane %v1280_v41, 7  ;;  %v1608_v58 = vrot.slane %v1607_v3, 4 }
 0x121   : > { %v937_v22 = vpack.c.bf16 %v905_v54, %v905_v54 }
 0x122   : > { %v4732_v5 = vsel %vm4402_vm3, %v1270_v35, %v1277_v15  ;;  %v1592_v15 = vrot.slane %v1235_v19, 5 }
 0x123   : > { %1696 = vrot.lane.b32.xlu2 %v1587_v26, %s5560_s20  ;;  %1016 = vrot.lane.b32.xlu1 %v937_v22, %s4052_s28  ;;  %v1240_v21 = vshrl.u32 %v937_v22, 16  ;;  %v1243_v10 = vshll.u32 %v937_v22, 16  ;;  %v4747_v22 = vpop.f32.mrf.mxu3  ;;  %v1238_v26 = vrot.slane %v4682_v25, 4 }
 0x125   : > { %v1410_v30 = vld [vmem:[#allocation2 + $0x8] sm:$0xf]  ;;  %v989_v37 = vpop.permute.xlu0 %988  ;;  %v1673_v39 = vpop.permute.xlu2 %1672  ;;  %v4734_v43 = vrot.slane %v1243_v10, 5  ;;  %v1597_v54 = vrot.slane %v1240_v21, 4  ;;  %v1242_v56 = vrot.slane %v1240_v21, 7  ;;  %v4752_v21 = vpack.c.bf16 %v911_v36, %v911_v36 }
 0x126   : > { %v1411_v34 = vsel %vm4718_vm12, %v4384_v12, %v1410_v30  ;;  %1085 = vst.msk [vmem:[#allocation2 + $0xc] sm:$0xf] %vm1083_vm9, %v989_v37  ;;  %v4755_v30 = vpop.f32.mrf.mxu0  ;;  %v1593_v36 = vor.u32 %v1592_v15, %v1591_v24  ;;  %v1601_v37 = vrot.slane %v1251_v17, 5 }
 0x127   : > { %1412 = vst [vmem:[#allocation2 + $0x8] sm:$0xf] %v1411_v34  ;;  %v1598_v61 = vor.u32 %v1597_v54, %v4734_v43  ;;  %v1245_v12 = vor.u32 %v1243_v10, %v1242_v56  ;;  %v1288_v57 = vshrl.u32 %v4752_v21, 16  ;;  %v1615_v56 = vrot.slane %v1272_v23, 4 }
 0x128   : > { %1414 = vst.msk [vmem:[#allocation2 + $0xc] sm:$0xf] %vm1407_vm10, %v4411_v42  ;;  %v1594_v3 = vrot.slane %v1593_v36, 4 }
 0x129   : > { %v1599_v35 = vrot.slane %v1598_v61, 4  ;;  %v4759_v42 = vsel %vm4402_vm3, %v1238_v26, %v1245_v12  ;;  %v1290_v17 = vrot.slane %v1288_v57, 7  ;;  %v1291_v26 = vshll.u32 %v4752_v21, 16 }
 0x12b   : > { %1020 = vrot.lane.b32.xlu2 %v4594_v47, %s4052_s28  ;;  %1018 = vrot.lane.b32.xlu1 %v4589_v31, %s4052_s28  ;;  %v1600_v47 = vrot.slane %v1248_v2, 4  ;;  %v4793_v2 = vrot.slane %v1275_v0, 5  ;;  %v881_v31 = vadd.f32 %v4354_v50, %v845_v45  ;;  %v880_v0 = vadd.f32 %v4354_v50, %v844_v1  ;;  %v4815_v24 = vpop.f32.mrf.mxu3 }
 0x12c   : > { %1702 = vrot.lane.b32.xlu0 %v1599_v35, %s5560_s20  ;;  %v1286_v50 = vrot.slane %v1282_v62, 4  ;;  %v1293_v45 = vor.u32 %v1291_v26, %v1290_v17  ;;  %v4825_v1 = vor.u32 %v1283_v7, %v1282_v62 }
 0x12d   : > { %v1675_v19 = vpop.permute.xlu1 %1674  ;;  %v997_v10 = vpop.permute.xlu2 %996  ;;  %v1616_v12 = vor.u32 %v1615_v56, %v4793_v2  ;;  %v1602_v35 = vor.u32 %v1601_v37, %v1600_v47  ;;  %v913_v15 = vmax.f32 %v881_v31, 0.0 }
 0x12e   : > { %v1477_v54 = vld [vmem:[#allocation2 + $0x8] sm:$0x1]  ;;  %1089 = vst.msk [vmem:[#allocation2 + $0x1c] sm:$0xf] %vm1083_vm9, %v997_v10  ;;  %v4828_v47 = vpop.f32.mrf.mxu0  ;;  %v4836_v62 = vsel %vm4402_vm3, %v1286_v50, %v1293_v45  ;;  %v1776_v50 = vld [vmem:[#allocation2 + $0x14] sm:$0xf] }
 0x12f   : > { %v1478_v34 = vsel %vm4772_vm15, 0, %v1477_v54  ;;  %v1772_v61 = vld [vmem:[#allocation2 + $0xc] sm:$0xf]  ;;  %1422 = vst.msk [vmem:[#allocation2 + $0x1c] sm:$0xf] %vm1407_vm10, %v4481_v11  ;;  %v3740_v11 = vld [vmem:[%s5555_s6 + $0x60] sm:$0xff] }
 0x130   : > { %1479 = vst [vmem:[#allocation2 + $0x8] sm:$0x1] %v1478_v34  ;;  %v1773_v23 = vsel %vm4783_vm0, %v1675_v19, %v1772_v61  ;;  %v912_v19 = vmax.f32 %v880_v0, 0.0  ;;  %2705 = vmatpush.bf16.msrb.mxu0 %v3740_v11  ;;  %3936 = vmatpush.bf16.msra.mxu2 %v3740_v11  ;;  %v1603_v37 = vrot.slane %v1602_v35, 4  ;;  %v1617_v56 = vrot.slane %v1616_v12, 4  ;;  %v4863_v11 = vpop.f32.mrf.mxu2 }
 0x131   : > { %1769 = vst.msk [vmem:[#allocation2 + $0x8] sm:$0xf] %vm1768_vm14, %v1673_v39  ;;  %v1596_v39 = vsel %vm4443_vm6, %v1594_v3, %v4734_v43  ;;  %v1610_v43 = vrot.slane %v1267_v51, 5  ;;  %v4844_v34 = vpack.c.bf16 %v913_v15, %v913_v15  ;;  %v847_v0 = vmul.f32 %v4345_v46, %v4747_v22  ;;  %v4870_v35 = vld [vmem:[%s5553_s4] ss:$0 sm:$0xff] }
 0x132   : > { %1774 = vst [vmem:[#allocation2 + $0xc] sm:$0xf] %v1773_v23  ;;  %v1605_v17 = vsel %vm4443_vm6, %v1603_v37, %v4726_v38  ;;  %v846_v46 = vmul.f32 %v4870_v35, %v4689_v53 }
 0x133   : > { %1022 = vrot.lane.b32.xlu2 %v4640_v28, %s4052_s28  ;;  %1706 = vrot.lane.b32.xlu1 %v1608_v58, %s5560_s20  ;;  %v1609_v58 = vrot.slane %v1264_v29, 4  ;;  %v4846_v29 = vpack.c.bf16 %v912_v19, %v912_v19  ;;  %v1304_v23 = vshrl.u32 %v4844_v34, 16  ;;  %v4865_v12 = vpop.f32.mrf.mxu3 }
 0x134   : > { %1700 = vrot.lane.b32.xlu0 %v1596_v39, %s5560_s20 }
 0x135   : > { %v991_v10 = vpop.permute.xlu1 %990  ;;  %v999_v36 = vpop.permute.xlu2 %998  ;;  %v1611_v51 = vor.u32 %v1610_v43, %v1609_v58  ;;  %v1296_v61 = vshrl.u32 %v4846_v29, 16  ;;  %v1306_v39 = vrot.slane %v1304_v23, 7 }
 0x136   : > { %1086 = vst.msk [vmem:[#allocation2 + $0x10] sm:$0xf] %vm1083_vm9, %v991_v10  ;;  %v4879_v10 = vrot.slane %v1291_v26, 5  ;;  %v4883_v58 = vpop.f32.mrf.mxu0  ;;  %v1307_v26 = vshll.u32 %v4844_v34, 16 }
 0x137   : > { %1090 = vst.msk [vmem:[#allocation2 + $0x20] sm:$0xf] %vm1083_vm9, %v999_v36  ;;  %v1298_v3 = vrot.slane %v1296_v61, 7  ;;  %v1612_v15 = vrot.slane %v1611_v51, 4  ;;  %v1624_v36 = vrot.slane %v1288_v57, 4 }
 0x139   : > { %v1838_v28 = vld [vmem:[#allocation2 + $0xc] sm:$0x8]  ;;  %v1302_v57 = vrot.slane %v1298_v3, 4 }
 0x13a   : > { %v1839_v31 = vsel %vm4839_vm4, 0, %v1838_v28  ;;  %v1309_v28 = vor.u32 %v1307_v26, %v1306_v39  ;;  %v4917_v39 = vpop.f32.mrf.mxu2 }
 0x13b   : > { %1840 = vst [vmem:[#allocation2 + $0xc] sm:$0x8] %v1839_v31  ;;  %1710 = vrot.lane.b32.xlu2 %v1617_v56, %s5560_s20  ;;  %1704 = vrot.lane.b32.xlu1 %v1605_v17, %s5560_s20  ;;  %v1299_v56 = vshll.u32 %v4846_v29, 16  ;;  %v1614_v17 = vsel %vm4443_vm6, %v1612_v15, %v4793_v2 }
 0x13c   : > { %1024 = vrot.lane.b32.xlu0 %v4651_v6, %s4052_s28  ;;  %5575 = vst [vmem:[#allocation6_spill] sm:$0xff] %v4917_v39 }
 0x13d   : > { %v1415_v38 = vld [vmem:[#allocation2 + $0x10] sm:$0xf]  ;;  %v1679_v22 = vpop.permute.xlu0 %1678 }
 0x13e   : > { %v1416_v6 = vsel %vm4718_vm12, %v4425_v59, %v1415_v38  ;;  %v1423_v45 = vld [vmem:[#allocation2 + $0x20] sm:$0xf]  ;;  %v1777_v19 = vsel %vm4783_vm0, %v1679_v22, %v1776_v50  ;;  %v995_v43 = vpop.permute.xlu1 %994  ;;  %v4902_v38 = vor.u32 %v1299_v56, %v1298_v3 }
 0x13f   : > { %1417 = vst [vmem:[#allocation2 + $0x10] sm:$0xf] %v1416_v6  ;;  %v1424_v53 = vsel %vm4718_vm12, %v4501_v49, %v1423_v45  ;;  %v4891_v59 = vld [vmem:[%s5554_s5] ss:$0 sm:$0xff]  ;;  %v4919_v6 = vpop.f32.mrf.mxu3 }
 0x140   : > { %v883_v37 = vadd.f32 %v4891_v59, %v847_v0  ;;  %1425 = vst [vmem:[#allocation2 + $0x20] sm:$0xf] %v1424_v53  ;;  %v882_v51 = vadd.f32 %v4891_v59, %v846_v46  ;;  %v1625_v0 = vor.u32 %v1624_v36, %v4879_v10  ;;  %v4909_v46 = vsel %vm4402_vm3, %v1302_v57, %v1309_v28  ;;  %v4931_v28 = vpop.f32.mrf.mxu0 }
 0x141   : > { %1778 = vst [vmem:[#allocation2 + $0x14] sm:$0xf] %v1777_v19  ;;  %v4925_v36 = vrot.slane %v1307_v26, 5  ;;  %v1633_v53 = vrot.slane %v1304_v23, 4  ;;  %v1618_v57 = vrot.slane %v1280_v41, 4  ;;  %v1619_v26 = vrot.slane %v1283_v7, 5 }
 0x142   : > { %1088 = vst.msk [vmem:[#allocation2 + $0x18] sm:$0xf] %vm1083_vm9, %v995_v43  ;;  %v3702_v49 = vld [vmem:[#allocation2 + $0x8] sm:$0xff]  ;;  %v915_v22 = vmax.f32 %v883_v37, 0.0  ;;  %v914_v50 = vmax.f32 %v882_v51, 0.0  ;;  %v1626_v15 = vrot.slane %v1625_v0, 4 }
 0x143   : > { %v3681_v31 = vld [vmem:[#allocation2 + $0x8] sm:$0xff]  ;;  %1708 = vrot.lane.b32.xlu2 %v1614_v17, %s5560_s20  ;;  %1028 = vrot.lane.b32.xlu1 %v4752_v21, %s4052_s28  ;;  %v1634_v41 = vor.u32 %v1633_v53, %v4925_v36 }
 0x144   : > { %3406 = vmatmul.msk.bf16.vlgmr.msrb.gmra.mxu2 %vm2097_vm8, %v3702_v49  ;;  %3511 = vmatmul.msk.bf16.gmra.mxu3 %vm2097_vm8, %v3681_v31  ;;  %v4923_v19 = vpack.c.bf16 %v915_v22, %v915_v22  ;;  %v946_v31 = vpack.c.bf16 %v914_v50, %v914_v50  ;;  %v1627_v22 = vrot.slane %v1296_v61, 4  ;;  %v1780_v50 = vld [vmem:[#allocation2 + $0x1c] sm:$0xf] }
 0x145   : > { %1026 = vrot.lane.b32.xlu0 %v4742_v9, %s4052_s28  ;;  %v4915_v2 = vpop.permute.xlu2 %1686  ;;  %v1677_v17 = vpop.permute.xlu0 %1676 }
 0x146   : > { %v1480_v3 = vld [vmem:[#allocation2 + $0x10] sm:$0x1]  ;;  %v1320_v0 = vshrl.u32 %v4923_v19, 16  ;;  %v1323_v9 = vshll.u32 %v4923_v19, 16  ;;  %v1312_v7 = vshrl.u32 %v946_v31, 16 }
 0x147   : > { %v1481_v21 = vsel %vm4772_vm15, 0, %v1480_v3  ;;  %v1486_v45 = vld [vmem:[#allocation2 + $0x20] sm:$0x1]  ;;  %v1628_v3 = vrot.slane %v1299_v56, 5 }
 0x148   : > { %1482 = vst [vmem:[#allocation2 + $0x10] sm:$0x1] %v1481_v21  ;;  %v1487_v43 = vsel %vm4772_vm15, 0, %v1486_v45  ;;  %v1841_v37 = vld [vmem:[#allocation2 + $0x14] sm:$0x8]  ;;  %v1620_v45 = vor.u32 %v1619_v26, %v1618_v57  ;;  %v1314_v53 = vrot.slane %v1312_v7, 7  ;;  %v4961_v57 = vpop.f32.mrf.mxu2  ;;  %v810_v26 = vpop.f32.mrf.mxu3 }
 0x149   : > { %1488 = vst [vmem:[#allocation2 + $0x20] sm:$0x1] %v1487_v43  ;;  %v1842_v51 = vsel %vm4839_vm4, 0, %v1841_v37  ;;  %v1419_v49 = vld [vmem:[#allocation2 + $0x18] sm:$0xf]  ;;  %v848_v43 = vmul.f32 %v4870_v35, %v4815_v24  ;;  %v4958_v61 = vrot.slane %v1323_v9, 5 }
 0x14a   : > { %1843 = vst [vmem:[#allocation2 + $0x14] sm:$0x8] %v1842_v51  ;;  %v1420_v23 = vsel %vm4718_vm12, %v4467_v52, %v1419_v49  ;;  %v849_v52 = vmul.f32 %v4870_v35, %v4865_v12  ;;  %v1635_v12 = vrot.slane %v1634_v41, 4  ;;  %v1642_v56 = vrot.slane %v1320_v0, 4 }
 0x14b   : > { %1421 = vst [vmem:[#allocation2 + $0x18] sm:$0xf] %v1420_v23  ;;  %1032 = vrot.lane.b32.xlu2 %v4844_v34, %s4052_s28  ;;  %1030 = vrot.lane.b32.xlu1 %v4846_v29, %s4052_s28  ;;  %v1322_v29 = vrot.slane %v1320_v0, 7  ;;  %v1629_v49 = vor.u32 %v1628_v3, %v1627_v22  ;;  %v1621_v23 = vrot.slane %v1620_v45, 4  ;;  %v1318_v41 = vrot.slane %v1314_v53, 4 }
 0x14c   : > { %1775 = vst.msk [vmem:[#allocation2 + $0x10] sm:$0xf] %vm1768_vm14, %v1677_v17  ;;  %v885_v51 = vadd.f32 %v4891_v59, %v849_v52  ;;  %v884_v17 = vadd.f32 %v4891_v59, %v848_v43  ;;  %v1643_v22 = vor.u32 %v1642_v56, %v4958_v61  ;;  %v851_v3 = vmul.f32 %v4870_v35, %v810_v26 }
 0x14d   : > { %1714 = vrot.lane.b32.xlu0 %v1626_v15, %s5560_s20  ;;  %v1683_v34 = vpop.permute.xlu1 %1682  ;;  %v1685_v21 = vpop.permute.xlu2 %1684  ;;  %v1315_v15 = vshll.u32 %v946_v31, 16  ;;  %5576 = vst [vmem:[#allocation7_spill] sm:$0xff] %v4961_v57  ;;  %v1325_v45 = vor.u32 %v1323_v9, %v1322_v29  ;;  %v1630_v57 = vrot.slane %v1629_v49, 4  ;;  %v1636_v39 = vrot.slane %v1312_v7, 4 }
 0x14e   : > { %v1781_v37 = vsel %vm4783_vm0, %v1683_v34, %v1780_v50  ;;  %1783 = vst.msk [vmem:[#allocation2 + $0x20] sm:$0xf] %vm1768_vm14, %v1685_v21  ;;  %v4964_v34 = vpop.f32.mrf.mxu0  ;;  %v917_v43 = vmax.f32 %v885_v51, 0.0  ;;  %v916_v9 = vmax.f32 %v884_v17, 0.0  ;;  %v850_v17 = vmul.f32 %v4870_v35, %v4919_v6 }
 0x14f   : > { %1782 = vst [vmem:[#allocation2 + $0x1c] sm:$0xf] %v1781_v37  ;;  %v4966_v50 = vor.u32 %v1315_v15, %v1314_v53  ;;  %v1637_v53 = vrot.slane %v1315_v15, 5  ;;  %v4981_v56 = vsel %vm4402_vm3, %v1318_v41, %v1325_v45  ;;  %v887_v15 = vadd.f32 %v4891_v59, %v851_v3 }
 0x150   : > { %v1632_v51 = vsel %vm4443_vm6, %v1630_v57, %v4925_v36  ;;  %v949_v26 = vpack.c.bf16 %v917_v43, %v917_v43  ;;  %v4999_v41 = vpop.f32.mrf.mxu2  ;;  %v813_v36 = vpop.f32.mrf.mxu3  ;;  %v886_v45 = vadd.f32 %v4891_v59, %v850_v17 }
 0x151   : > { %v1638_v49 = vor.u32 %v1637_v53, %v1636_v39  ;;  %v3747_v39 = vld [vmem:[%s5558_s9 + $0x8] sm:$0xff] }
 0x152   : > { %v1483_v24 = vld [vmem:[#allocation2 + $0x18] sm:$0x1]  ;;  %3010 = vmatpush.bf16.msrb.mxu1 %v3747_v39 }
 0x153   : > { %v1484_v21 = vsel %vm4772_vm15, 0, %v1483_v24  ;;  %v3703_v0 = vld [vmem:[#allocation2 + $0x10] sm:$0xff]  ;;  %1034 = vrot.lane.b32.xlu2 %v946_v31, %s4052_s28  ;;  %1718 = vrot.lane.b32.xlu1 %v1635_v12, %s5560_s20  ;;  %v1623_v31 = vsel %vm4443_vm6, %v1621_v23, %v4879_v10  ;;  %v1644_v10 = vrot.slane %v1643_v22, 4  ;;  %v4995_v23 = vpack.c.bf16 %v916_v9, %v916_v9 }
 0x154   : > { %v3682_v37 = vld [vmem:[#allocation2 + $0x10] sm:$0xff]  ;;  %1485 = vst [vmem:[#allocation2 + $0x18] sm:$0x1] %v1484_v21  ;;  %3407 = vmatmul.msk.bf16.gmra.mxu2 %vm2097_vm8, %v3703_v0  ;;  %v919_v21 = vmax.f32 %v887_v15, 0.0  ;;  %v1336_v0 = vshrl.u32 %v949_v26, 16  ;;  %v1339_v22 = vshll.u32 %v949_v26, 16 }
 0x155   : > { %v3724_v52 = vld [vmem:[#allocation2 + $0x10] sm:$0xff]  ;;  %3512 = vmatmul.msk.bf16.gmra.mxu3 %vm2097_vm8, %v3682_v37  ;;  %v1681_v12 = vpop.permute.xlu1 %1680  ;;  %v1001_v24 = vpop.permute.xlu0 %1000  ;;  %1712 = vrot.lane.b32.xlu0 %v1623_v31, %s5560_s20  ;;  %v1328_v57 = vshrl.u32 %v4995_v23, 16  ;;  %v1331_v31 = vshll.u32 %v4995_v23, 16  ;;  %v918_v15 = vmax.f32 %v886_v45, 0.0 }
 0x156   : > { %v1844_v29 = vld [vmem:[#allocation2 + $0x1c] sm:$0x8]  ;;  %3626 = vmatmul.msk.bf16.vlgmr.msrb.gmra.mxu0 %vm2097_vm8, %v3724_v52  ;;  %1779 = vst.msk [vmem:[#allocation2 + $0x18] sm:$0xf] %vm1768_vm14, %v1681_v12  ;;  %v5007_v37 = vpop.f32.mrf.mxu0  ;;  %v1338_v43 = vrot.slane %v1336_v0, 7  ;;  %v5014_v53 = vpack.c.bf16 %v919_v21, %v919_v21 }
 0x157   : > { %v1845_v7 = vsel %vm4839_vm4, 0, %v1844_v29  ;;  %1091 = vst.msk [vmem:[#allocation2 + $0x24] sm:$0xf] %vm1083_vm9, %v1001_v24  ;;  %v1330_v3 = vrot.slane %v1328_v57, 7  ;;  %v1645_v45 = vrot.slane %v1328_v57, 4 }
 0x158   : > { %1846 = vst [vmem:[#allocation2 + $0x1c] sm:$0x8] %v1845_v7  ;;  %v5025_v7 = vrot.slane %v1339_v22, 5  ;;  %v1341_v17 = vor.u32 %v1339_v22, %v1338_v43  ;;  %v5034_v39 = vpop.f32.mrf.mxu2 }
 0x159   : > { %1426 = vst.msk [vmem:[#allocation2 + $0x24] sm:$0xf] %vm1407_vm10, %v4517_v27  ;;  %v1639_v27 = vrot.slane %v1638_v49, 4  ;;  %v1334_v49 = vrot.slane %v1330_v3, 4  ;;  %v5027_v21 = vor.u32 %v1331_v31, %v1330_v3 }
 0x15b   : > { %1722 = vrot.lane.b32.xlu2 %v1644_v10, %s5560_s20  ;;  %1716 = vrot.lane.b32.xlu1 %v1632_v51, %s5560_s20  ;;  %v1641_v24 = vsel %vm4443_vm6, %v1639_v27, %v4958_v61  ;;  %v1651_v10 = vrot.slane %v1336_v0, 4  ;;  %v1355_v61 = vshll.u32 %v5014_v53, 16  ;;  %v5038_v27 = vsel %vm4402_vm3, %v1334_v49, %v1341_v17 }
 0x15d   : > { %v1003_v52 = vpop.permute.xlu0 %1002  ;;  %v1009_v6 = vpop.permute.xlu2 %1008  ;;  %1036 = vrot.lane.b32.xlu0 %v4923_v19, %s4052_s28 }
 0x15e   : > { %1092 = vst.msk [vmem:[#allocation2 + $0x28] sm:$0xf] %vm1083_vm9, %v1003_v52  ;;  %v5050_v43 = vpop.f32.mrf.mxu0 }
 0x15f   : > { %1095 = vst.msk [vmem:[#allocation2 + $0x34] sm:$0xf] %vm1083_vm9, %v1009_v6  ;;  %v3704_v9 = vld [vmem:[#allocation2 + $0x18] sm:$0xff]  ;;  %v815_v6 = vpop.f32.mrf.mxu3 }
 0x160   : > { %v1784_v12 = vld [vmem:[#allocation2 + $0x24] sm:$0xf]  ;;  %1434 = vst.msk [vmem:[#allocation2 + $0x34] sm:$0xf] %vm1407_vm10, %v4587_v40  ;;  %v3683_v29 = vld [vmem:[#allocation2 + $0x18] sm:$0xff]  ;;  %v852_v40 = vmul.f32 %v4870_v35, %v813_v36  ;;  %v950_v36 = vpack.c.bf16 %v918_v15, %v918_v15 }
 0x161   : > { %v1785_v19 = vsel %vm4783_vm0, %v4915_v2, %v1784_v12  ;;  %v3725_v51 = vld [vmem:[#allocation2 + $0x18] sm:$0xff]  ;;  %v1352_v2 = vshrl.u32 %v5014_v53, 16 }
 0x162   : > { %1786 = vst [vmem:[#allocation2 + $0x24] sm:$0xf] %v1785_v19  ;;  %v888_v12 = vadd.f32 %v4891_v59, %v852_v40 }
 0x163   : > { %1720 = vrot.lane.b32.xlu2 %v1641_v24, %s5560_s20  ;;  %1040 = vrot.lane.b32.xlu1 %v949_v26, %s4052_s28  ;;  %v1652_v26 = vor.u32 %v1651_v10, %v5025_v7  ;;  %v5055_v24 = vrot.slane %v1355_v61, 5  ;;  %v1660_v19 = vrot.slane %v1352_v2, 4 }
 0x164   : > { %3408 = vmatmul.msk.bf16.gmra.mxu2 %vm2097_vm8, %v3704_v9  ;;  %v1344_v9 = vshrl.u32 %v950_v36, 16 }
 0x165   : > { %v1427_v0 = vld [vmem:[#allocation2 + $0x28] sm:$0xf]  ;;  %3513 = vmatmul.msk.bf16.gmra.mxu3 %vm2097_vm8, %v3683_v29  ;;  %v1005_v52 = vpop.permute.xlu1 %1004  ;;  %1038 = vrot.lane.b32.xlu0 %v4995_v23, %s4052_s28  ;;  %v1011_v3 = vpop.permute.xlu2 %1010  ;;  %v1347_v29 = vshll.u32 %v950_v36, 16  ;;  %v853_v23 = vmul.f32 %v4870_v35, %v815_v6  ;;  %v1653_v15 = vrot.slane %v1652_v26, 4  ;;  %v1354_v26 = vrot.slane %v1352_v2, 7 }
 0x166   : > { %v1428_v22 = vsel %vm4718_vm12, %v4536_v13, %v1427_v0  ;;  %3627 = vmatmul.msk.bf16.gmra.mxu0 %vm2097_vm8, %v3725_v51  ;;  %1093 = vst.msk [vmem:[#allocation2 + $0x2c] sm:$0xf] %vm1083_vm9, %v1005_v52  ;;  %v1646_v13 = vrot.slane %v1331_v31, 5  ;;  %v920_v51 = vmax.f32 %v888_v12, 0.0  ;;  %v1661_v31 = vor.u32 %v1660_v19, %v5055_v24 }
 0x167   : > { %1429 = vst [vmem:[#allocation2 + $0x28] sm:$0xf] %v1428_v22  ;;  %v1654_v35 = vrot.slane %v1344_v9, 4  ;;  %v1655_v17 = vrot.slane %v1347_v29, 5  ;;  %v1346_v52 = vrot.slane %v1344_v9, 7 }
 0x168   : > { %1430 = vst.msk [vmem:[#allocation2 + $0x2c] sm:$0xf] %vm1407_vm10, %v4553_v48  ;;  %v1647_v49 = vor.u32 %v1646_v13, %v1645_v45  ;;  %v889_v48 = vadd.f32 %v4891_v59, %v853_v23  ;;  %v1662_v45 = vrot.slane %v1661_v31, 4  ;;  %v5074_v59 = vpop.f32.mrf.mxu2 }
 0x169   : > { %v1847_v10 = vld [vmem:[#allocation2 + $0x24] sm:$0x8]  ;;  %1096 = vst.msk [vmem:[#allocation2 + $0x38] sm:$0xf] %vm1083_vm9, %v1011_v3  ;;  %v1656_v23 = vor.u32 %v1655_v17, %v1654_v35  ;;  %v1350_v31 = vrot.slane %v1346_v52, 4 }
 0x16a   : > { %v1848_v57 = vsel %vm4839_vm4, 0, %v1847_v10  ;;  %v1648_v12 = vrot.slane %v1647_v49, 4  ;;  %v921_v9 = vmax.f32 %v889_v48, 0.0  ;;  %v5078_v10 = vpop.f32.mrf.mxu0  ;;  %v1357_v49 = vor.u32 %v1355_v61, %v1354_v26 }
 0x16b   : > { %1849 = vst [vmem:[#allocation2 + $0x24] sm:$0x8] %v1848_v57  ;;  %1044 = vrot.lane.b32.xlu2 %v5014_v53, %s4052_s28  ;;  %1042 = vrot.lane.b32.xlu1 %v950_v36, %s4052_s28  ;;  %v5072_v36 = vpack.c.bf16 %v920_v51, %v920_v51 }
 0x16c   : > { %v953_v17 = vpack.c.bf16 %v921_v9, %v921_v9  ;;  %v5097_v53 = vsel %vm4402_vm3, %v1350_v31, %v1357_v49 }
 0x16d   : > { %v1691_v40 = vpop.permute.xlu0 %1690  ;;  %v1007_v0 = vpop.permute.xlu1 %1006  ;;  %1726 = vrot.lane.b32.xlu0 %v1653_v15, %s5560_s20  ;;  %v1360_v48 = vshrl.u32 %v5072_v36, 16  ;;  %v1363_v35 = vshll.u32 %v5072_v36, 16 }
 0x16e   : > { %v1489_v6 = vld [vmem:[#allocation2 + $0x28] sm:$0x1]  ;;  %1094 = vst.msk [vmem:[#allocation2 + $0x30] sm:$0xf] %vm1083_vm9, %v1007_v0  ;;  %v5085_v0 = vor.u32 %v1347_v29, %v1346_v52 }
 0x16f   : > { %v1490_v22 = vsel %vm4772_vm15, 0, %v1489_v6  ;;  %v1788_v3 = vld [vmem:[#allocation2 + $0x2c] sm:$0xf]  ;;  %v1663_v26 = vrot.slane %v1360_v48, 4  ;;  %v1362_v49 = vrot.slane %v1360_v48, 7 }
 0x170   : > { %1491 = vst [vmem:[#allocation2 + $0x28] sm:$0x1] %v1490_v22  ;;  %v1435_v19 = vld [vmem:[#allocation2 + $0x38] sm:$0xf]  ;;  %v1789_v13 = vsel %vm4783_vm0, %v1691_v40, %v1788_v3  ;;  %v1657_v40 = vrot.slane %v1656_v23, 4  ;;  %v1664_v22 = vrot.slane %v1363_v35, 5 }
 0x171   : > { %v1436_v2 = vsel %vm4718_vm12, %v4617_v33, %v1435_v19  ;;  %1790 = vst [vmem:[#allocation2 + $0x2c] sm:$0xf] %v1789_v13  ;;  %v1650_v33 = vsel %vm4443_vm6, %v1648_v12, %v5025_v7  ;;  %v1371_v7 = vshll.u32 %v953_v17, 16  ;;  %v5114_v19 = vpop.f32.mrf.mxu2 }
 0x172   : > { %1437 = vst [vmem:[#allocation2 + $0x38] sm:$0xf] %v1436_v2  ;;  %v3705_v57 = vld [vmem:[#allocation2 + $0x20] sm:$0xff]  ;;  %v1659_v3 = vsel %vm4443_vm6, %v1657_v40, %v5055_v24  ;;  %v5118_v9 = vpop.f32.mrf.mxu0 }
 0x173   : > { %v3684_v15 = vld [vmem:[#allocation2 + $0x20] sm:$0xff]  ;;  %1046 = vrot.lane.b32.xlu2 %v5072_v36, %s4052_s28  ;;  %1730 = vrot.lane.b32.xlu1 %v1662_v45, %s5560_s20  ;;  %v1368_v45 = vshrl.u32 %v953_v17, 16  ;;  %v1667_v23 = vrot.slane %v1371_v7, 5 }
 0x174   : > { %v3726_v51 = vld [vmem:[#allocation2 + $0x20] sm:$0xff]  ;;  %3409 = vmatmul.msk.bf16.gmra.mxu2 %vm2097_vm8, %v3705_v57  ;;  %v1665_v57 = vor.u32 %v1664_v22, %v1663_v26 }
 0x175   : > { %v1431_v61 = vld [vmem:[#allocation2 + $0x30] sm:$0xf]  ;;  %3514 = vmatmul.msk.bf16.gmra.mxu3 %vm2097_vm8, %v3684_v15  ;;  %v1689_v29 = vpop.permute.xlu0 %1688  ;;  %v5101_v52 = vpop.permute.xlu2 %1698  ;;  %1724 = vrot.lane.b32.xlu0 %v1650_v33, %s5560_s20  ;;  %v1669_v2 = vrot.slane %v1368_v45, 4  ;;  %v1370_v26 = vrot.slane %v1368_v45, 7 }
 0x176   : > { %v1432_v6 = vsel %vm4718_vm12, %v4567_v8, %v1431_v61  ;;  %3628 = vmatmul.msk.bf16.gmra.mxu0 %vm2097_vm8, %v3726_v51  ;;  %1787 = vst.msk [vmem:[#allocation2 + $0x28] sm:$0xf] %vm1768_vm14, %v1689_v29  ;;  %v1792_v51 = vld [vmem:[#allocation2 + $0x34] sm:$0xf] }
 0x177   : > { %1433 = vst [vmem:[#allocation2 + $0x30] sm:$0xf] %v1432_v6  ;;  %v1670_v24 = vor.u32 %v1669_v2, %v1667_v23  ;;  %v1666_v6 = vrot.slane %v1665_v57, 4 }
 0x178   : > { %v1850_v36 = vld [vmem:[#allocation2 + $0x2c] sm:$0x8] }
 0x179   : > { %v1495_v12 = vld [vmem:[#allocation2 + $0x38] sm:$0x1]  ;;  %v1851_v8 = vsel %vm4839_vm4, 0, %v1850_v36  ;;  %v1671_v61 = vrot.slane %v1670_v24, 4 }
 0x17a   : > { %v1496_v13 = vsel %vm4772_vm15, 0, %v1495_v12  ;;  %1852 = vst [vmem:[#allocation2 + $0x2c] sm:$0x8] %v1851_v8  ;;  %v1373_v12 = vor.u32 %v1371_v7, %v1370_v26  ;;  %v5130_v8 = vpop.f32.mrf.mxu2  ;;  %v5134_v2 = vpop.f32.mrf.mxu0 }
 0x17b   : > { %1497 = vst [vmem:[#allocation2 + $0x38] sm:$0x1] %v1496_v13  ;;  %1728 = vrot.lane.b32.xlu1 %v1659_v3, %s5560_s20  ;;  %1734 = vrot.lane.b32.xlu2 %v1671_v61, %s5560_s20  ;;  %v5128_v3 = vor.u32 %v1363_v35, %v1362_v49  ;;  %v1668_v13 = vsel %vm4443_vm6, %v1666_v6, %v1667_v23 }
 0x17d   : > { %v1695_v15 = vpop.permute.xlu1 %1694  ;;  %v1697_v31 = vpop.permute.xlu2 %1696  ;;  %1048 = vrot.lane.b32.xlu0 %v953_v17, %s4052_s28  ;;  %v1366_v17 = vrot.slane %v1362_v49, 4 }
 0x17e   : > { %v1492_v33 = vld [vmem:[#allocation2 + $0x30] sm:$0x1]  ;;  %v1793_v40 = vsel %vm4783_vm0, %v1695_v15, %v1792_v51  ;;  %1795 = vst.msk [vmem:[#allocation2 + $0x38] sm:$0xf] %vm1768_vm14, %v1697_v31 }
 0x17f   : > { %v1493_v29 = vsel %vm4772_vm15, 0, %v1492_v33  ;;  %1794 = vst [vmem:[#allocation2 + $0x34] sm:$0xf] %v1793_v40  ;;  %v5138_v45 = vsel %vm4402_vm3, %v1366_v17, %v1373_v12  ;;  %vm2955_vm3 = vcmask 261120  }
 0x180   : > { %1494 = vst [vmem:[#allocation2 + $0x30] sm:$0x1] %v1493_v29 }
 0x181   : > { %v3706_v22 = vld [vmem:[#allocation2 + $0x28] sm:$0xff] }
 0x182   : > { %v3685_v48 = vld [vmem:[#allocation2 + $0x28] sm:$0xff]  ;;  %v5153_v23 = vpop.f32.mrf.mxu2  ;;  %v5157_v51 = vpop.f32.mrf.mxu0 }
 0x183   : > { %v3727_v36 = vld [vmem:[#allocation2 + $0x28] sm:$0xff] }
 0x184   : > { %3410 = vmatmul.msk.bf16.gmra.mxu2 %vm2097_vm8, %v3706_v22 }
 0x185   : > { %3515 = vmatmul.msk.bf16.gmra.mxu3 %vm2097_vm8, %v3685_v48  ;;  %v1693_v57 = vpop.permute.xlu1 %1692  ;;  %v1013_v35 = vpop.permute.xlu0 %1012  ;;  %1732 = vrot.lane.b32.xlu0 %v1668_v13, %s5560_s20 }
 0x186   : > { %v1853_v24 = vld [vmem:[#allocation2 + $0x34] sm:$0x8]  ;;  %3629 = vmatmul.msk.bf16.gmra.mxu0 %vm2097_vm8, %v3727_v36  ;;  %1791 = vst.msk [vmem:[#allocation2 + $0x30] sm:$0xf] %vm1768_vm14, %v1693_v57  ;;  %v1021_v7 = vpop.permute.xlu2 %1020 }
 0x187   : > { %v1854_v20 = vsel %vm4839_vm4, 0, %v1853_v24  ;;  %1097 = vst.msk [vmem:[#allocation2 + $0x3c] sm:$0xf] %vm1083_vm9, %v1013_v35 }
 0x188   : > { %1855 = vst [vmem:[#allocation2 + $0x34] sm:$0x8] %v1854_v20 }
 0x189   : > { %1438 = vst.msk [vmem:[#allocation2 + $0x3c] sm:$0xf] %vm1407_vm10, %v4661_v44 }
 0x18a   : > { %1101 = vst.msk [vmem:[#allocation2 + $0x4c] sm:$0xf] %vm1083_vm9, %v1021_v7  ;;  %v5177_v48 = vpop.f32.mrf.mxu2 }
 0x18b   : > { %1446 = vst.msk [vmem:[#allocation2 + $0x4c] sm:$0xf] %vm1407_vm10, %v4655_v16  ;;  %v3746_v16 = vld [vmem:[%s5558_s9] sm:$0xff] }
 0x18c   : > { %3011 = vmatpush.bf16.msrb.mxu1 %v3746_v16 }
 0x18d   : > { %v1015_v32 = vpop.permute.xlu0 %1014 }
 0x18e   : > { %v1023_v15 = vpop.permute.xlu2 %1022  ;;  %1098 = vst.msk [vmem:[#allocation2 + $0x40] sm:$0xf] %vm1083_vm9, %v1015_v32 }
 0x18f   : > { %1102 = vst.msk [vmem:[#allocation2 + $0x50] sm:$0xf] %vm1083_vm9, %v1023_v15  ;;  %v3707_v49 = vld [vmem:[#allocation2 + $0x30] sm:$0xff] }
 0x190   : > { %v1796_v31 = vld [vmem:[#allocation2 + $0x3c] sm:$0xf]  ;;  %v3686_v33 = vld [vmem:[#allocation2 + $0x30] sm:$0xff] }
 0x191   : > { %v1797_v44 = vsel %vm4783_vm0, %v5101_v52, %v1796_v31  ;;  %v3728_v40 = vld [vmem:[#allocation2 + $0x30] sm:$0xff] }
 0x192   : > { %1798 = vst [vmem:[#allocation2 + $0x3c] sm:$0xf] %v1797_v44  ;;  %v5192_v32 = vpop.f32.mrf.mxu2 }
 0x194   : > { %3411 = vmatmul.msk.bf16.gmra.mxu2 %vm2097_vm8, %v3707_v49 }
 0x195   : > { %v1439_v61 = vld [vmem:[#allocation2 + $0x40] sm:$0xf]  ;;  %3516 = vmatmul.msk.bf16.gmra.mxu3 %vm2097_vm8, %v3686_v33  ;;  %v1017_v29 = vpop.permute.xlu1 %1016 }
 0x196   : > { %v1447_v6 = vld [vmem:[#allocation2 + $0x50] sm:$0xf]  ;;  %v1440_v26 = vsel %vm4718_vm12, %v4697_v55, %v1439_v61  ;;  %3630 = vmatmul.msk.bf16.gmra.mxu0 %vm2097_vm8, %v3728_v40  ;;  %v5171_v52 = vpop.permute.xlu2 %1710  ;;  %1099 = vst.msk [vmem:[#allocation2 + $0x44] sm:$0xf] %vm1083_vm9, %v1017_v29  ;;  %v5181_v55 = vpop.f32.mrf.mxu0  ;;  %v1804_v29 = vld [vmem:[#allocation2 + $0x4c] sm:$0xf] }
 0x197   : > { %v1448_v22 = vsel %vm4718_vm12, %v4710_v60, %v1447_v6  ;;  %1441 = vst [vmem:[#allocation2 + $0x40] sm:$0xf] %v1440_v26 }
 0x198   : > { %1449 = vst [vmem:[#allocation2 + $0x50] sm:$0xf] %v1448_v22 }
 0x199   : > { %v1856_v36 = vld [vmem:[#allocation2 + $0x3c] sm:$0x8]  ;;  %1442 = vst.msk [vmem:[#allocation2 + $0x44] sm:$0xf] %vm1407_vm10, %v4759_v42 }
 0x19a   : > { %v1857_v17 = vsel %vm4839_vm4, 0, %v1856_v36 }
 0x19b   : > { %1858 = vst [vmem:[#allocation2 + $0x3c] sm:$0x8] %v1857_v17 }
 0x19d   : > { %v1019_v12 = vpop.permute.xlu1 %1018 }
 0x19e   : > { %v1498_v13 = vld [vmem:[#allocation2 + $0x40] sm:$0x1]  ;;  %v1709_v57 = vpop.permute.xlu2 %1708  ;;  %1100 = vst.msk [vmem:[#allocation2 + $0x48] sm:$0xf] %vm1083_vm9, %v1019_v12  ;;  %v1703_v60 = vpop.permute.xlu0 %1702 }
 0x19f   : > { %v1504_v35 = vld [vmem:[#allocation2 + $0x50] sm:$0x1]  ;;  %v1499_v24 = vsel %vm4772_vm15, 0, %v1498_v13  ;;  %v5195_v49 = vpop.f32.mrf.mxu0 }
 0x1a0   : > { %v1505_v7 = vsel %vm4772_vm15, 0, %v1504_v35  ;;  %1500 = vst [vmem:[#allocation2 + $0x40] sm:$0x1] %v1499_v24  ;;  %v1800_v42 = vld [vmem:[#allocation2 + $0x44] sm:$0xf] }
 0x1a1   : > { %1506 = vst [vmem:[#allocation2 + $0x50] sm:$0x1] %v1505_v7  ;;  %v1801_v20 = vsel %vm4783_vm0, %v1703_v60, %v1800_v42 }
 0x1a2   : > { %1807 = vst.msk [vmem:[#allocation2 + $0x50] sm:$0xf] %vm1768_vm14, %v1709_v57  ;;  %v3708_v15 = vld [vmem:[#allocation2 + $0x38] sm:$0xff] }
 0x1a3   : > { %v3687_v31 = vld [vmem:[#allocation2 + $0x38] sm:$0xff]  ;;  %1802 = vst [vmem:[#allocation2 + $0x44] sm:$0xf] %v1801_v20 }
 0x1a4   : > { %v3729_v44 = vld [vmem:[#allocation2 + $0x38] sm:$0xff]  ;;  %3412 = vmatmul.msk.bf16.gmra.mxu2 %vm2097_vm8, %v3708_v15  ;;  %v5222_v15 = vpop.f32.mrf.mxu3 }
 0x1a5   : > { %v1443_v33 = vld [vmem:[#allocation2 + $0x48] sm:$0xf]  ;;  %3517 = vmatmul.msk.bf16.gmra.mxu3 %vm2097_vm8, %v3687_v31  ;;  %v1707_v40 = vpop.permute.xlu1 %1706 }
 0x1a6   : > { %v1444_v16 = vsel %vm4718_vm12, %v4665_v18, %v1443_v33  ;;  %3631 = vmatmul.msk.bf16.gmra.mxu0 %vm2097_vm8, %v3729_v44  ;;  %v1033_v61 = vpop.permute.xlu2 %1032  ;;  %v1701_v6 = vpop.permute.xlu0 %1700  ;;  %v1805_v26 = vsel %vm4783_vm0, %v1707_v40, %v1804_v29 }
 0x1a7   : > { %1445 = vst [vmem:[#allocation2 + $0x48] sm:$0xf] %v1444_v16  ;;  %v5211_v18 = vpop.f32.mrf.mxu2  ;;  %v5213_v12 = vpop.f32.mrf.mxu0 }
 0x1a8   : > { %1107 = vst.msk [vmem:[#allocation2 + $0x64] sm:$0xf] %vm1083_vm9, %v1033_v61 }
 0x1a9   : > { %1458 = vst.msk [vmem:[#allocation2 + $0x64] sm:$0xf] %vm1407_vm10, %v4909_v46 }
 0x1aa   : > { %v1859_v22 = vld [vmem:[#allocation2 + $0x44] sm:$0x8]  ;;  %1806 = vst [vmem:[#allocation2 + $0x4c] sm:$0xf] %v1805_v26 }
 0x1ab   : > { %v1860_v36 = vsel %vm4839_vm4, 0, %v1859_v22  ;;  %1799 = vst.msk [vmem:[#allocation2 + $0x40] sm:$0xf] %vm1768_vm14, %v1701_v6 }
 0x1ac   : > { %1861 = vst [vmem:[#allocation2 + $0x44] sm:$0x8] %v1860_v36  ;;  %v5245_v22 = vpop.f32.mrf.mxu3 }
 0x1ad   : > { %v1705_v17 = vpop.permute.xlu1 %1704 }
 0x1ae   : > { %v1501_v13 = vld [vmem:[#allocation2 + $0x48] sm:$0x1]  ;;  %v1035_v57 = vpop.permute.xlu2 %1034  ;;  %v1025_v60 = vpop.permute.xlu0 %1024 }
 0x1af   : > { %v1502_v35 = vsel %vm4772_vm15, 0, %v1501_v13  ;;  %1108 = vst.msk [vmem:[#allocation2 + $0x68] sm:$0xf] %vm1083_vm9, %v1035_v57  ;;  %v5226_v31 = vpop.f32.mrf.mxu2  ;;  %v5239_v61 = vpop.f32.mrf.mxu0 }
 0x1b0   : > { %1503 = vst [vmem:[#allocation2 + $0x48] sm:$0x1] %v1502_v35 }
 0x1b1   : > { %v1862_v46 = vld [vmem:[#allocation2 + $0x4c] sm:$0x8]  ;;  %1803 = vst.msk [vmem:[#allocation2 + $0x48] sm:$0xf] %vm1768_vm14, %v1705_v17 }
 0x1b2   : > { %v1863_v24 = vsel %vm4839_vm4, 0, %v1862_v46  ;;  %1103 = vst.msk [vmem:[#allocation2 + $0x54] sm:$0xf] %vm1083_vm9, %v1025_v60 }
 0x1b3   : > { %1864 = vst [vmem:[#allocation2 + $0x4c] sm:$0x8] %v1863_v24  ;;  %v3709_v7 = vld [vmem:[#allocation2 + $0x40] sm:$0xff] }
 0x1b4   : > { %v3688_v42 = vld [vmem:[#allocation2 + $0x40] sm:$0xff]  ;;  %1450 = vst.msk [vmem:[#allocation2 + $0x54] sm:$0xf] %vm1407_vm10, %v4732_v5  ;;  %3413 = vmatmul.msk.bf16.gmra.mxu2 %vm2097_vm8, %v3709_v7 }
 0x1b5   : > { %v3730_v20 = vld [vmem:[#allocation2 + $0x40] sm:$0xff]  ;;  %3518 = vmatmul.msk.bf16.gmra.mxu3 %vm2097_vm8, %v3688_v42  ;;  %v1029_v44 = vpop.permute.xlu1 %1028 }
 0x1b6   : > { %v1459_v33 = vld [vmem:[#allocation2 + $0x68] sm:$0xf]  ;;  %3632 = vmatmul.msk.bf16.gmra.mxu0 %vm2097_vm8, %v3730_v20  ;;  %v5231_v40 = vpop.permute.xlu2 %1722  ;;  %1105 = vst.msk [vmem:[#allocation2 + $0x5c] sm:$0xf] %vm1083_vm9, %v1029_v44 }
 0x1b7   : > { %v1460_v16 = vsel %vm4718_vm12, %v4966_v50, %v1459_v33  ;;  %1454 = vst.msk [vmem:[#allocation2 + $0x5c] sm:$0xf] %vm1407_vm10, %v4836_v62  ;;  %v1027_v5 = vpop.permute.xlu0 %1026  ;;  %v5248_v17 = vpop.f32.mrf.mxu2 }
 0x1b8   : > { %1461 = vst [vmem:[#allocation2 + $0x68] sm:$0xf] %v1460_v16  ;;  %v5257_v46 = vpop.f32.mrf.mxu0 }
 0x1b9   : > { %1104 = vst.msk [vmem:[#allocation2 + $0x58] sm:$0xf] %vm1083_vm9, %v1027_v5 }
 0x1ba   : > { %v3710_v24 = vld [vmem:[#allocation2 + $0x48] sm:$0xff] }
 0x1bb   : > { %v1808_v29 = vld [vmem:[#allocation2 + $0x54] sm:$0xf]  ;;  %v3689_v7 = vld [vmem:[#allocation2 + $0x48] sm:$0xff] }
 0x1bc   : > { %v1809_v6 = vsel %vm4783_vm0, %v5171_v52, %v1808_v29  ;;  %v3731_v20 = vld [vmem:[#allocation2 + $0x48] sm:$0xff]  ;;  %v1816_v29 = vld [vmem:[#allocation2 + $0x64] sm:$0xf] }
 0x1bd   : > { %1810 = vst [vmem:[#allocation2 + $0x54] sm:$0xf] %v1809_v6  ;;  %v1031_v26 = vpop.permute.xlu1 %1030 }
 0x1be   : > { %v1721_v36 = vpop.permute.xlu2 %1720  ;;  %1106 = vst.msk [vmem:[#allocation2 + $0x60] sm:$0xf] %vm1083_vm9, %v1031_v26  ;;  %v1812_v50 = vld [vmem:[#allocation2 + $0x5c] sm:$0xf] }
 0x1bf   : > { %v1513_v62 = vld [vmem:[#allocation2 + $0x68] sm:$0x1]  ;;  %v1715_v13 = vpop.permute.xlu0 %1714 }
 0x1c0   : > { %v1514_v57 = vsel %vm4772_vm15, 0, %v1513_v62  ;;  %v1451_v60 = vld [vmem:[#allocation2 + $0x58] sm:$0xf]  ;;  %v1813_v35 = vsel %vm4783_vm0, %v1715_v13, %v1812_v50 }
 0x1c1   : > { %1515 = vst [vmem:[#allocation2 + $0x68] sm:$0x1] %v1514_v57  ;;  %v1452_v52 = vsel %vm4718_vm12, %v4825_v1, %v1451_v60  ;;  %v5277_v57 = vpop.f32.mrf.mxu0 }
 0x1c2   : > { %1453 = vst [vmem:[#allocation2 + $0x58] sm:$0xf] %v1452_v52 }
 0x1c3   : > { %1819 = vst.msk [vmem:[#allocation2 + $0x68] sm:$0xf] %vm1768_vm14, %v1721_v36 }
 0x1c4   : > { %v1865_v42 = vld [vmem:[#allocation2 + $0x54] sm:$0x8]  ;;  %1814 = vst [vmem:[#allocation2 + $0x5c] sm:$0xf] %v1813_v35  ;;  %3414 = vmatmul.msk.bf16.gmra.mxu2 %vm2097_vm8, %v3710_v24 }
 0x1c5   : > { %v1866_v44 = vsel %vm4839_vm4, 0, %v1865_v42  ;;  %v1455_v33 = vld [vmem:[#allocation2 + $0x60] sm:$0xf]  ;;  %3519 = vmatmul.msk.bf16.gmra.mxu3 %vm2097_vm8, %v3689_v7  ;;  %v1719_v1 = vpop.permute.xlu1 %1718 }
 0x1c6   : > { %1867 = vst [vmem:[#allocation2 + $0x54] sm:$0x8] %v1866_v44  ;;  %v1456_v16 = vsel %vm4718_vm12, %v4902_v38, %v1455_v33  ;;  %3633 = vmatmul.msk.bf16.gmra.mxu0 %vm2097_vm8, %v3731_v20  ;;  %v1045_v5 = vpop.permute.xlu2 %1044  ;;  %v1817_v6 = vsel %vm4783_vm0, %v1719_v1, %v1816_v29 }
 0x1c7   : > { %1457 = vst [vmem:[#allocation2 + $0x60] sm:$0xf] %v1456_v16  ;;  %v2155_v26 = vpop.f32.mrf.mxu2  ;;  %v5270_v36 = vpop.f32.mrf.mxu3 }
 0x1c8   : > { %1113 = vst.msk [vmem:[#allocation2 + $0x7c] sm:$0xf] %vm1083_vm9, %v1045_v5  ;;  %v1713_v50 = vpop.permute.xlu0 %1712  ;;  %v2409_v29 = vadd.f32 %v5222_v15, %v2155_v26 }
 0x1c9   : > { %v1507_v62 = vld [vmem:[#allocation2 + $0x58] sm:$0x1]  ;;  %1470 = vst.msk [vmem:[#allocation2 + $0x7c] sm:$0xf] %vm1407_vm10, %v5097_v53 }
 0x1ca   : > { %v1508_v38 = vsel %vm4772_vm15, 0, %v1507_v62  ;;  %1818 = vst [vmem:[#allocation2 + $0x64] sm:$0xf] %v1817_v6 }
 0x1cb   : > { %1509 = vst [vmem:[#allocation2 + $0x58] sm:$0x1] %v1508_v38  ;;  %v1868_v13 = vld [vmem:[#allocation2 + $0x5c] sm:$0x8] }
 0x1cc   : > { %v1869_v60 = vsel %vm4839_vm4, 0, %v1868_v13  ;;  %1811 = vst.msk [vmem:[#allocation2 + $0x58] sm:$0xf] %vm1768_vm14, %v1713_v50  ;;  %v5299_v13 = vld [vmem:[%s5556_s7] ss:$0 sm:$0xff] }
 0x1cd   : > { %1870 = vst [vmem:[#allocation2 + $0x5c] sm:$0x8] %v1869_v60  ;;  %v1717_v52 = vpop.permute.xlu1 %1716  ;;  %v3711_v16 = vld [vmem:[#allocation2 + $0x50] sm:$0xff] }
 0x1ce   : > { %v1510_v35 = vld [vmem:[#allocation2 + $0x60] sm:$0x1]  ;;  %v1047_v24 = vpop.permute.xlu2 %1046  ;;  %v3690_v5 = vld [vmem:[#allocation2 + $0x50] sm:$0xff] }
 0x1cf   : > { %v1511_v53 = vsel %vm4772_vm15, 0, %v1510_v35  ;;  %1114 = vst.msk [vmem:[#allocation2 + $0x80] sm:$0xf] %vm1083_vm9, %v1047_v24  ;;  %v2157_v7 = vpop.f32.mrf.mxu2  ;;  %v5285_v42 = vpop.f32.mrf.mxu3  ;;  %v3732_v6 = vld [vmem:[#allocation2 + $0x50] sm:$0xff]  ;;  %v5316_v24 = vld [vmem:[%s5557_s8] ss:$0 sm:$0xff] }
 0x1d0   : > { %1512 = vst [vmem:[#allocation2 + $0x60] sm:$0x1] %v1511_v53  ;;  %v1037_v20 = vpop.permute.xlu0 %1036 }
 0x1d1   : > { %v1871_v44 = vld [vmem:[#allocation2 + $0x64] sm:$0x8]  ;;  %1815 = vst.msk [vmem:[#allocation2 + $0x60] sm:$0xf] %vm1768_vm14, %v1717_v52  ;;  %v2411_v52 = vadd.f32 %v5245_v22, %v2157_v7 }
 0x1d2   : > { %v1872_v33 = vsel %vm4839_vm4, 0, %v1871_v44  ;;  %1109 = vst.msk [vmem:[#allocation2 + $0x6c] sm:$0xf] %vm1083_vm9, %v1037_v20 }
 0x1d3   : > { %1873 = vst [vmem:[#allocation2 + $0x64] sm:$0x8] %v1872_v33  ;;  %v2707_v1 = vpop.f32.mrf.mxu0 }
 0x1d4   : > { %1462 = vst.msk [vmem:[#allocation2 + $0x6c] sm:$0xf] %vm1407_vm10, %v4981_v56  ;;  %3415 = vmatmul.msk.bf16.gmra.mxu2 %vm2097_vm8, %v3711_v16  ;;  %v2787_v38 = vadd.f32 %v2707_v1, %v2409_v29 }
 0x1d5   : > { %3520 = vmatmul.msk.bf16.gmra.mxu3 %vm2097_vm8, %v3690_v5  ;;  %v1041_v50 = vpop.permute.xlu1 %1040 }
 0x1d6   : > { %v1471_v62 = vld [vmem:[#allocation2 + $0x80] sm:$0xf]  ;;  %3634 = vmatmul.msk.bf16.gmra.mxu0 %vm2097_vm8, %v3732_v6  ;;  %1111 = vst.msk [vmem:[#allocation2 + $0x74] sm:$0xf] %vm1083_vm9, %v1041_v50  ;;  %v2823_v35 = vmul.f32 %v5299_v13, %v2787_v38 }
 0x1d7   : > { %v1472_v56 = vsel %vm4718_vm12, %v5128_v3, %v1471_v62  ;;  %1466 = vst.msk [vmem:[#allocation2 + $0x74] sm:$0xf] %vm1407_vm10, %v5038_v27  ;;  %v2160_v26 = vpop.f32.mrf.mxu2 }
 0x1d8   : > { %1473 = vst [vmem:[#allocation2 + $0x80] sm:$0xf] %v1472_v56  ;;  %v1039_v15 = vpop.permute.xlu0 %1038  ;;  %v5309_v60 = vpop.f32.mrf.mxu3  ;;  %v2859_v33 = vadd.f32 %v5316_v24, %v2823_v35  ;;  %v3712_v35 = vld [vmem:[#allocation2 + $0x58] sm:$0xff] }
 0x1d9   : > { %1110 = vst.msk [vmem:[#allocation2 + $0x70] sm:$0xf] %vm1083_vm9, %v1039_v15 }
 0x1da   : > { %v2891_v56 = vmax.f32 %v2859_v33, 0.0  ;;  %v1828_v33 = vld [vmem:[#allocation2 + $0x7c] sm:$0xf] }
 0x1db   : > { %v1820_v3 = vld [vmem:[#allocation2 + $0x6c] sm:$0xf]  ;;  %v2709_v53 = vpop.f32.mrf.mxu0 }
 0x1dc   : > { %v1821_v27 = vsel %vm4783_vm0, %v5231_v40, %v1820_v3  ;;  %v2788_v20 = vadd.f32 %v2709_v53, %v2411_v52  ;;  %v3691_v3 = vld [vmem:[#allocation2 + $0x58] sm:$0xff] }
 0x1dd   : > { %1822 = vst [vmem:[#allocation2 + $0x6c] sm:$0xf] %v1821_v27  ;;  %v1043_v44 = vpop.permute.xlu1 %1042  ;;  %v2414_v27 = vadd.f32 %v5270_v36, %v2160_v26 }
 0x1de   : > { %v2824_v22 = vmul.f32 %v5299_v13, %v2788_v20  ;;  %1112 = vst.msk [vmem:[#allocation2 + $0x78] sm:$0xf] %vm1083_vm9, %v1043_v44  ;;  %v1824_v7 = vld [vmem:[#allocation2 + $0x74] sm:$0xf]  ;;  %v3733_v20 = vld [vmem:[#allocation2 + $0x58] sm:$0xff] }
 0x1df   : > { %v1522_v1 = vld [vmem:[#allocation2 + $0x80] sm:$0x1]  ;;  %v2162_v50 = vpop.f32.mrf.mxu2 }
 0x1e0   : > { %v1523_v16 = vsel %vm4772_vm15, 0, %v1522_v1  ;;  %v1463_v5 = vld [vmem:[#allocation2 + $0x70] sm:$0xf]  ;;  %v2860_v29 = vadd.f32 %v5316_v24, %v2824_v22  ;;  %v1727_v6 = vpop.permute.xlu0 %1726  ;;  %v5332_v38 = vpop.f32.mrf.mxu3 }
 0x1e1   : > { %1524 = vst [vmem:[#allocation2 + $0x80] sm:$0x1] %v1523_v16  ;;  %v1464_v40 = vsel %vm4718_vm12, %v5027_v21, %v1463_v5  ;;  %v1825_v62 = vsel %vm4783_vm0, %v1727_v6, %v1824_v7 }
 0x1e2   : > { %1465 = vst [vmem:[#allocation2 + $0x70] sm:$0xf] %v1464_v40  ;;  %v2892_v15 = vmax.f32 %v2860_v29, 0.0 }
 0x1e3   : > { %1826 = vst [vmem:[#allocation2 + $0x74] sm:$0xf] %v1825_v62  ;;  %v2712_v52 = vpop.f32.mrf.mxu0 }
 0x1e4   : > { %v1874_v53 = vld [vmem:[#allocation2 + $0x6c] sm:$0x8]  ;;  %v2923_v44 = vpack.c.bf16 %v2892_v15, %v2891_v56  ;;  %3416 = vmatmul.msk.bf16.gmra.mxu2 %vm2097_vm8, %v3712_v35  ;;  %v2789_v16 = vadd.f32 %v2712_v52, %v2414_v27 }
 0x1e5   : > { %v1875_v21 = vsel %vm4839_vm4, 0, %v1874_v53  ;;  %v1467_v22 = vld [vmem:[#allocation2 + $0x78] sm:$0xf]  ;;  %3521 = vmatmul.msk.bf16.gmra.mxu3 %vm2097_vm8, %v3691_v3  ;;  %v1731_v7 = vpop.permute.xlu1 %1730 }
 0x1e6   : > { %1876 = vst [vmem:[#allocation2 + $0x6c] sm:$0x8] %v1875_v21  ;;  %v1468_v1 = vsel %vm4718_vm12, %v5085_v0, %v1467_v22  ;;  %3635 = vmatmul.msk.bf16.gmra.mxu0 %vm2097_vm8, %v3733_v20  ;;  %3650 = vmatmul.msk.bf16.vlgmr.msrb.gmra.mxu1 %vm2955_vm3, %v2923_v44  ;;  %v1829_v36 = vsel %vm4783_vm0, %v1731_v7, %v1828_v33 }
 0x1e7   : > { %1469 = vst [vmem:[#allocation2 + $0x78] sm:$0xf] %v1468_v1  ;;  %v2165_v5 = vpop.f32.mrf.mxu2  ;;  %v2416_v0 = vadd.f32 %v5285_v42, %v2162_v50  ;;  %v2825_v62 = vmul.f32 %v5299_v13, %v2789_v16  ;;  %v3713_v16 = vld [vmem:[#allocation2 + $0x60] sm:$0xff] }
 0x1e8   : > { %1830 = vst [vmem:[#allocation2 + $0x7c] sm:$0xf] %v1829_v36  ;;  %v1725_v26 = vpop.permute.xlu0 %1724  ;;  %v5346_v6 = vpop.f32.mrf.mxu3  ;;  %v3692_v36 = vld [vmem:[#allocation2 + $0x60] sm:$0xff] }
 0x1e9   : > { %v1516_v29 = vld [vmem:[#allocation2 + $0x70] sm:$0x1]  ;;  %v2861_v3 = vadd.f32 %v5316_v24, %v2825_v62 }
 0x1ea   : > { %v1517_v40 = vsel %vm4772_vm15, 0, %v1516_v29  ;;  %v1877_v4 = vld [vmem:[#allocation2 + $0x74] sm:$0x8]  ;;  %v3734_v29 = vld [vmem:[#allocation2 + $0x60] sm:$0xff] }
 0x1eb   : > { %1518 = vst [vmem:[#allocation2 + $0x70] sm:$0x1] %v1517_v40  ;;  %v1878_v56 = vsel %vm4839_vm4, 0, %v1877_v4  ;;  %v2714_v15 = vpop.f32.mrf.mxu0  ;;  %v2893_v7 = vmax.f32 %v2861_v3, 0.0 }
 0x1ec   : > { %1879 = vst [vmem:[#allocation2 + $0x74] sm:$0x8] %v1878_v56  ;;  %v2790_v52 = vadd.f32 %v2714_v15, %v2416_v0  ;;  %v1735_v0 = vpop.permute.xlu2 %1734 }
 0x1ed   : > { %1823 = vst.msk [vmem:[#allocation2 + $0x70] sm:$0xf] %vm1768_vm14, %v1725_v26  ;;  %v1729_v33 = vpop.permute.xlu1 %1728  ;;  %v2419_v26 = vadd.f32 %v5309_v60, %v2165_v5 }
 0x1ee   : > { %v1519_v35 = vld [vmem:[#allocation2 + $0x78] sm:$0x1]  ;;  %v2826_v53 = vmul.f32 %v5299_v13, %v2790_v52 }
 0x1ef   : > { %v1520_v27 = vsel %vm4772_vm15, 0, %v1519_v35  ;;  %v1880_v42 = vld [vmem:[#allocation2 + $0x7c] sm:$0x8]  ;;  %v2167_v21 = vpop.f32.mrf.mxu2 }
 0x1f0   : > { %1521 = vst [vmem:[#allocation2 + $0x78] sm:$0x1] %v1520_v27  ;;  %v1881_v50 = vsel %vm4839_vm4, 0, %v1880_v42  ;;  %v2862_v20 = vadd.f32 %v5316_v24, %v2826_v53  ;;  %v1049_v44 = vpop.permute.xlu0 %1048  ;;  %v2425_v22 = vpop.f32.mrf.mxu3  ;;  %v2421_v60 = vadd.f32 %v5332_v38, %v2167_v21 }
 0x1f1   : > { %1882 = vst [vmem:[#allocation2 + $0x7c] sm:$0x8] %v1881_v50 }
 0x1f2   : > { %1115 = vst.msk [vmem:[#allocation2 + $0x84] sm:$0xf] %vm1083_vm9, %v1049_v44  ;;  %v2894_v1 = vmax.f32 %v2862_v20, 0.0 }
 0x1f3   : > { %1474 = vst.msk [vmem:[#allocation2 + $0x84] sm:$0xf] %vm1407_vm10, %v5138_v45  ;;  %v2717_v25 = vpop.f32.mrf.mxu0 }
 0x1f4   : > { %1827 = vst.msk [vmem:[#allocation2 + $0x78] sm:$0xf] %vm1768_vm14, %v1729_v33  ;;  %v2924_v40 = vpack.c.bf16 %v2894_v1, %v2893_v7  ;;  %3417 = vmatmul.msk.bf16.gmra.mxu2 %vm2097_vm8, %v3713_v16  ;;  %v2791_v4 = vadd.f32 %v2717_v25, %v2419_v26  ;;  %v3714_v7 = vld [vmem:[#allocation2 + $0x68] sm:$0xff] }
 0x1f5   : > { %3522 = vmatmul.msk.bf16.gmra.mxu3 %vm2097_vm8, %v3692_v36  ;;  %v3693_v1 = vld [vmem:[#allocation2 + $0x68] sm:$0xff] }
 0x1f6   : > { %3636 = vmatmul.msk.bf16.gmra.mxu0 %vm2097_vm8, %v3734_v29  ;;  %3651 = vmatmul.msk.bf16.gmra.mxu1 %vm2955_vm3, %v2924_v40  ;;  %v2827_v5 = vmul.f32 %v5299_v13, %v2791_v4  ;;  %v3735_v16 = vld [vmem:[#allocation2 + $0x68] sm:$0xff] }
 0x1f7   : > { %v2170_v45 = vpop.f32.mrf.mxu2 }
 0x1f8   : > { %v1733_v62 = vpop.permute.xlu0 %1732  ;;  %v2428_v56 = vpop.f32.mrf.mxu3  ;;  %v2863_v53 = vadd.f32 %v5316_v24, %v2827_v5  ;;  %v2424_v14 = vadd.f32 %v5346_v6, %v2170_v45 }
 0x1f9   : > { %1831 = vst.msk [vmem:[#allocation2 + $0x80] sm:$0xf] %vm1768_vm14, %v1733_v62 }
 0x1fa   : > { %v1832_v15 = vld [vmem:[#allocation2 + $0x84] sm:$0xf]  ;;  %v2895_v44 = vmax.f32 %v2863_v53, 0.0  ;;  %v3715_v53 = vld [vmem:[#allocation2 + $0x70] sm:$0xff] }
 0x1fb   : > { %v1833_v52 = vsel %vm4783_vm0, %v1735_v0, %v1832_v15  ;;  %v2719_v35 = vpop.f32.mrf.mxu0 }
 0x1fc   : > { %1834 = vst [vmem:[#allocation2 + $0x84] sm:$0xf] %v1833_v52  ;;  %v2792_v3 = vadd.f32 %v2719_v35, %v2421_v60 }
 0x1fe   : > { %v2828_v27 = vmul.f32 %v5299_v13, %v2792_v3 }
 0x1ff   : > { %v2172_v50 = vpop.f32.mrf.mxu2 }
 0x200   : > { %v2864_v42 = vadd.f32 %v5316_v24, %v2828_v27  ;;  %v2430_v20 = vpop.f32.mrf.mxu3  ;;  %v2426_v4 = vadd.f32 %v2425_v22, %v2172_v50  ;;  %v3694_v27 = vld [vmem:[#allocation2 + $0x70] sm:$0xff] }
 0x202   : > { %v2896_v33 = vmax.f32 %v2864_v42, 0.0 }
 0x203   : > { %v1883_v38 = vld [vmem:[#allocation2 + $0x84] sm:$0x8]  ;;  %v2722_v21 = vpop.f32.mrf.mxu0 }
 0x204   : > { %v1884_v25 = vsel %vm4839_vm4, 0, %v1883_v38  ;;  %v2925_v36 = vpack.c.bf16 %v2896_v33, %v2895_v44  ;;  %3418 = vmatmul.msk.bf16.gmra.mxu2 %vm2097_vm8, %v3714_v7  ;;  %v2793_v26 = vadd.f32 %v2722_v21, %v2424_v14  ;;  %v3736_v44 = vld [vmem:[#allocation2 + $0x70] sm:$0xff] }
 0x205   : > { %1885 = vst [vmem:[#allocation2 + $0x84] sm:$0x8] %v1884_v25  ;;  %3523 = vmatmul.msk.bf16.gmra.mxu3 %vm2097_vm8, %v3693_v1 }
 0x206   : > { %3637 = vmatmul.msk.bf16.gmra.mxu0 %vm2097_vm8, %v3735_v16  ;;  %3652 = vmatmul.msk.bf16.gmra.mxu1 %vm2955_vm3, %v2925_v36  ;;  %v2829_v6 = vmul.f32 %v5299_v13, %v2793_v26 }
 0x207   : > { %v2175_v29 = vpop.f32.mrf.mxu2 }
 0x208   : > { %v2433_v40 = vpop.f32.mrf.mxu3  ;;  %v2865_v45 = vadd.f32 %v5316_v24, %v2829_v6  ;;  %v2429_v42 = vadd.f32 %v2428_v56, %v2175_v29 }
 0x20a   : > { %v2897_v52 = vmax.f32 %v2865_v45, 0.0 }
 0x20b   : > { %v2724_v0 = vpop.f32.mrf.mxu0 }
 0x20c   : > { %v2794_v54 = vadd.f32 %v2724_v0, %v2426_v4  ;;  %v3716_v0 = vld [vmem:[#allocation2 + $0x78] sm:$0xff] }
 0x20e   : > { %v2830_v62 = vmul.f32 %v5299_v13, %v2794_v54  ;;  %v3695_v54 = vld [vmem:[#allocation2 + $0x78] sm:$0xff] }
 0x20f   : > { %v2177_v5 = vpop.f32.mrf.mxu2 }
 0x210   : > { %v2866_v60 = vadd.f32 %v5316_v24, %v2830_v62  ;;  %v2435_v15 = vpop.f32.mrf.mxu3  ;;  %v2431_v21 = vadd.f32 %v2430_v20, %v2177_v5  ;;  %v3737_v20 = vld [vmem:[#allocation2 + $0x78] sm:$0xff] }
 0x212   : > { %v2898_v35 = vmax.f32 %v2866_v60, 0.0 }
 0x213   : > { %v2727_v3 = vpop.f32.mrf.mxu0 }
 0x214   : > { %v2926_v22 = vpack.c.bf16 %v2898_v35, %v2897_v52  ;;  %3419 = vmatmul.msk.bf16.gmra.mxu2 %vm2097_vm8, %v3715_v53  ;;  %v2795_v50 = vadd.f32 %v2727_v3, %v2429_v42 }
 0x215   : > { %3524 = vmatmul.msk.bf16.gmra.mxu3 %vm2097_vm8, %v3694_v27 }
 0x216   : > { %3638 = vmatmul.msk.bf16.gmra.mxu0 %vm2097_vm8, %v3736_v44  ;;  %3653 = vmatmul.msk.bf16.gmra.mxu1 %vm2955_vm3, %v2926_v22  ;;  %v2831_v7 = vmul.f32 %v5299_v13, %v2795_v50 }
 0x217   : > { %v2180_v33 = vpop.f32.mrf.mxu2 }
 0x218   : > { %v2438_v38 = vpop.f32.mrf.mxu3  ;;  %v2867_v56 = vadd.f32 %v5316_v24, %v2831_v7  ;;  %v2434_v45 = vadd.f32 %v2433_v40, %v2180_v33 }
 0x21a   : > { %v2899_v29 = vmax.f32 %v2867_v56, 0.0 }
 0x21b   : > { %v2729_v1 = vpop.f32.mrf.mxu0 }
 0x21c   : > { %v2796_v14 = vadd.f32 %v2729_v1, %v2431_v21  ;;  %v3717_v1 = vld [vmem:[#allocation2 + $0x80] sm:$0xff] }
 0x21e   : > { %v2832_v25 = vmul.f32 %v5299_v13, %v2796_v14 }
 0x21f   : > { %v2182_v36 = vpop.f32.mrf.mxu2 }
 0x220   : > { %v2868_v16 = vadd.f32 %v5316_v24, %v2832_v25  ;;  %v2440_v26 = vpop.f32.mrf.mxu3  ;;  %v2436_v35 = vadd.f32 %v2435_v15, %v2182_v36  ;;  %v3738_v25 = vld [vmem:[#allocation2 + $0x80] sm:$0xff] }
 0x222   : > { %v2900_v4 = vmax.f32 %v2868_v16, 0.0 }
 0x223   : > { %v2732_v6 = vpop.f32.mrf.mxu0 }
 0x224   : > { %v2927_v62 = vpack.c.bf16 %v2900_v4, %v2899_v29  ;;  %3420 = vmatmul.msk.bf16.gmra.mxu2 %vm2097_vm8, %v3716_v0  ;;  %v2797_v60 = vadd.f32 %v2732_v6, %v2434_v45 }
 0x225   : > { %3525 = vmatmul.msk.bf16.gmra.mxu3 %vm2097_vm8, %v3695_v54 }
 0x226   : > { %3639 = vmatmul.msk.bf16.gmra.mxu0 %vm2097_vm8, %v3737_v20  ;;  %3654 = vmatmul.msk.bf16.gmra.mxu1 %vm2955_vm3, %v2927_v62  ;;  %v2833_v3 = vmul.f32 %v5299_v13, %v2797_v60  ;;  %v3739_v60 = vld [vmem:[#allocation2 + $0x88] sm:$0xff] }
 0x227   : > { %v2185_v5 = vpop.f32.mrf.mxu2 }
 0x228   : > { %v2443_v52 = vpop.f32.mrf.mxu3  ;;  %v2869_v40 = vadd.f32 %v5316_v24, %v2833_v3  ;;  %v2439_v14 = vadd.f32 %v2438_v38, %v2185_v5 }
 0x22a   : > { %v2901_v33 = vmax.f32 %v2869_v40, 0.0 }
 0x22b   : > { %v2734_v53 = vpop.f32.mrf.mxu0 }
 0x22c   : > { %v2798_v27 = vadd.f32 %v2734_v53, %v2436_v35 }
 0x22e   : > { %v2834_v42 = vmul.f32 %v5299_v13, %v2798_v27 }
 0x22f   : > { %v2187_v22 = vpop.f32.mrf.mxu2 }
 0x230   : > { %v2870_v44 = vadd.f32 %v5316_v24, %v2834_v42  ;;  %v2445_v50 = vpop.f32.mrf.mxu3  ;;  %v2441_v29 = vadd.f32 %v2440_v26, %v2187_v22 }
 0x232   : > { %v2902_v21 = vmax.f32 %v2870_v44, 0.0 }
 0x233   : > { %v2737_v7 = vpop.f32.mrf.mxu0 }
 0x234   : > { %v2928_v56 = vpack.c.bf16 %v2902_v21, %v2901_v33  ;;  %3421 = vmatmul.msk.bf16.gmra.mxu2 %vm2097_vm8, %v3717_v1  ;;  %v2799_v15 = vadd.f32 %v2737_v7, %v2439_v14 }
 0x236   : > { %3640 = vmatmul.msk.bf16.gmra.mxu0 %vm2097_vm8, %v3738_v25  ;;  %3655 = vmatmul.msk.bf16.gmra.mxu1 %vm2955_vm3, %v2928_v56  ;;  %v2835_v4 = vmul.f32 %v5299_v13, %v2799_v15 }
 0x237   : > { %v2190_v16 = vpop.f32.mrf.mxu2 }
 0x238   : > { %v2448_v36 = vpop.f32.mrf.mxu3  ;;  %v2871_v54 = vadd.f32 %v5316_v24, %v2835_v4  ;;  %v2444_v53 = vadd.f32 %v2443_v52, %v2190_v16 }
 0x23a   : > { %v2903_v5 = vmax.f32 %v2871_v54, 0.0 }
 0x23b   : > { %v2739_v6 = vpop.f32.mrf.mxu0 }
 0x23c   : > { %v2800_v0 = vadd.f32 %v2739_v6, %v2441_v29 }
 0x23e   : > { %v2836_v38 = vmul.f32 %v5299_v13, %v2800_v0 }
 0x23f   : > { %v2192_v62 = vpop.f32.mrf.mxu2 }
 0x240   : > { %v2872_v45 = vadd.f32 %v5316_v24, %v2836_v38  ;;  %v2450_v20 = vpop.f32.mrf.mxu3  ;;  %v2446_v42 = vadd.f32 %v2445_v50, %v2192_v62 }
 0x242   : > { %v2904_v35 = vmax.f32 %v2872_v45, 0.0 }
 0x243   : > { %v2742_v3 = vpop.f32.mrf.mxu0 }
 0x244   : > { %v2929_v27 = vpack.c.bf16 %v2904_v35, %v2903_v5  ;;  %3641 = vmatmul.msk.bf16.vlgmr.msra.gmra.mxu2 %vm2097_vm8, %v3739_v60  ;;  %v2801_v26 = vadd.f32 %v2742_v3, %v2444_v53 }
 0x246   : > { %3656 = vmatmul.msk.bf16.gmra.mxu1 %vm2955_vm3, %v2929_v27  ;;  %v2837_v44 = vmul.f32 %v5299_v13, %v2801_v26 }
 0x247   : > { %v2195_v40 = vpop.f32.mrf.mxu2 }
 0x248   : > { %v2453_v22 = vpop.f32.mrf.mxu3  ;;  %v2873_v7 = vadd.f32 %v5316_v24, %v2837_v44  ;;  %v2449_v16 = vadd.f32 %v2448_v36, %v2195_v40 }
 0x24a   : > { %v2905_v56 = vmax.f32 %v2873_v7, 0.0 }
 0x24b   : > { %v2744_v33 = vpop.f32.mrf.mxu0 }
 0x24c   : > { %v2802_v21 = vadd.f32 %v2744_v33, %v2446_v42 }
 0x24e   : > { %v2838_v1 = vmul.f32 %v5299_v13, %v2802_v21 }
 0x24f   : > { %v2197_v52 = vpop.f32.mrf.mxu2 }
 0x250   : > { %v2874_v14 = vadd.f32 %v5316_v24, %v2838_v1  ;;  %v2455_v4 = vpop.f32.mrf.mxu3  ;;  %v2451_v0 = vadd.f32 %v2450_v20, %v2197_v52 }
 0x252   : > { %v2906_v25 = vmax.f32 %v2874_v14, 0.0 }
 0x253   : > { %v2747_v15 = vpop.f32.mrf.mxu0 }
 0x254   : > { %v2930_v29 = vpack.c.bf16 %v2906_v25, %v2905_v56  ;;  %v2803_v6 = vadd.f32 %v2747_v15, %v2449_v16 }
 0x256   : > { %3657 = vmatmul.msk.bf16.gmra.mxu1 %vm2955_vm3, %v2930_v29  ;;  %v2839_v54 = vmul.f32 %v5299_v13, %v2803_v6 }
 0x257   : > { %v2200_v50 = vpop.f32.mrf.mxu2 }
 0x258   : > { %v2875_v62 = vadd.f32 %v5316_v24, %v2839_v54  ;;  %v2458_v60 = vpop.f32.mrf.mxu3  ;;  %v2454_v40 = vadd.f32 %v2453_v22, %v2200_v50 }
 0x25a   : > { %v2907_v3 = vmax.f32 %v2875_v62, 0.0 }
 0x25b   : > { %v2749_v38 = vpop.f32.mrf.mxu0 }
 0x25c   : > { %v2804_v45 = vadd.f32 %v2749_v38, %v2451_v0 }
 0x25e   : > { %v2840_v5 = vmul.f32 %v5299_v13, %v2804_v45 }
 0x25f   : > { %v2202_v35 = vpop.f32.mrf.mxu2 }
 0x260   : > { %v2876_v36 = vadd.f32 %v5316_v24, %v2840_v5  ;;  %v2460_v44 = vpop.f32.mrf.mxu3  ;;  %v2456_v21 = vadd.f32 %v2455_v4, %v2202_v35 }
 0x262   : > { %v2908_v53 = vmax.f32 %v2876_v36, 0.0 }
 0x263   : > { %v2752_v27 = vpop.f32.mrf.mxu0  ;;  %v3013_v26 = vpop.f32.mrf.mxu1 }
 0x264   : > { %v2931_v20 = vpack.c.bf16 %v2908_v53, %v2907_v3  ;;  %v2805_v42 = vadd.f32 %v2752_v27, %v2454_v40  ;;  %v3014_v52 = vadd.f32 %v3013_v26, %v4706_v63 }
 0x266   : > { %3658 = vmatmul.msk.bf16.gmra.mxu1 %vm2955_vm3, %v2931_v20  ;;  %v2841_v7 = vmul.f32 %v5299_v13, %v2805_v42 }
 0x267   : > { %v2205_v33 = vpop.f32.mrf.mxu2 }
 0x268   : > { %v2877_v22 = vadd.f32 %v5316_v24, %v2841_v7  ;;  %v2463_v50 = vpop.f32.mrf.mxu3  ;;  %v2459_v38 = vadd.f32 %v2458_v60, %v2205_v33 }
 0x26a   : > { %v2909_v6 = vmax.f32 %v2877_v22, 0.0 }
 0x26b   : > { %v2754_v1 = vpop.f32.mrf.mxu0  ;;  %v3015_v14 = vpop.f32.mrf.mxu1 }
 0x26c   : > { %v2806_v56 = vadd.f32 %v2754_v1, %v2456_v21  ;;  %v3016_v25 = vadd.f32 %v3015_v14, %v4755_v30 }
 0x26e   : > { %v2842_v15 = vmul.f32 %v5299_v13, %v2806_v56  ;;  %v3816_v16 = vpack.c.bf16 %v3016_v25, %v3014_v52 }
 0x26f   : > { %v2207_v4 = vpop.f32.mrf.mxu2 }
 0x270   : > { %v2878_v29 = vadd.f32 %v5316_v24, %v2842_v15  ;;  %3817 = vst [vmem:[%s5434_s21] sm:$0xff] %v3816_v16   ;;  %v2461_v5 = vadd.f32 %v2460_v44, %v2207_v4  ;;  %v2465_v53 = vpop.f32.mrf.mxu3 }
 0x272   : > { %v2910_v0 = vmax.f32 %v2878_v29, 0.0 }
 0x273   : > { %v2757_v54 = vpop.f32.mrf.mxu0  ;;  %v3018_v63 = vpop.f32.mrf.mxu1 }
 0x274   : > { %v2932_v45 = vpack.c.bf16 %v2910_v0, %v2909_v6  ;;  %v2807_v30 = vadd.f32 %v2757_v54, %v2459_v38  ;;  %v3019_v27 = vadd.f32 %v3018_v63, %v4828_v47 }
 0x276   : > { %3659 = vmatmul.msk.bf16.gmra.mxu1 %vm2955_vm3, %v2932_v45  ;;  %v2843_v36 = vmul.f32 %v5299_v13, %v2807_v30 }
 0x277   : > { %v2210_v62 = vpop.f32.mrf.mxu2 }
 0x278   : > { %v2879_v20 = vadd.f32 %v5316_v24, %v2843_v36  ;;  %v2464_v52 = vadd.f32 %v2463_v50, %v2210_v62  ;;  %v2468_v25 = vpop.f32.mrf.mxu3 }
 0x27a   : > { %v2911_v44 = vmax.f32 %v2879_v20, 0.0 }
 0x27b   : > { %v2759_v35 = vpop.f32.mrf.mxu0  ;;  %v3020_v3 = vpop.f32.mrf.mxu1 }
 0x27c   : > { %v2808_v26 = vadd.f32 %v2759_v35, %v2461_v5  ;;  %v3021_v40 = vadd.f32 %v3020_v3, %v4883_v58 }
 0x27e   : > { %v2844_v60 = vmul.f32 %v5299_v13, %v2808_v26  ;;  %v3821_v42 = vpack.c.bf16 %v3021_v40, %v3019_v27 }
 0x27f   : > { %v2212_v21 = vpop.f32.mrf.mxu2 }
 0x280   : > { %v2880_v33 = vadd.f32 %v5316_v24, %v2844_v60  ;;  %3908 = vst [vmem:[%s5434_s21 + $0x8] sm:$0xff] %v3821_v42   ;;  %v2466_v22 = vadd.f32 %v2465_v53, %v2212_v21  ;;  %v2470_v38 = vpop.f32.mrf.mxu3 }
 0x282   : > { %v2912_v7 = vmax.f32 %v2880_v33, 0.0 }
 0x283   : > { %v2762_v1 = vpop.f32.mrf.mxu0  ;;  %v3023_v14 = vpop.f32.mrf.mxu1 }
 0x284   : > { %v2933_v56 = vpack.c.bf16 %v2912_v7, %v2911_v44  ;;  %v2809_v47 = vadd.f32 %v2762_v1, %v2464_v52  ;;  %v3024_v4 = vadd.f32 %v3023_v14, %v4931_v28 }
 0x286   : > { %3660 = vmatmul.msk.bf16.gmra.mxu1 %vm2955_vm3, %v2933_v56  ;;  %v2845_v15 = vmul.f32 %v5299_v13, %v2809_v47 }
 0x287   : > { %v2215_v58 = vpop.f32.mrf.mxu2 }
 0x288   : > { %v2881_v54 = vadd.f32 %v5316_v24, %v2845_v15  ;;  %v2469_v3 = vadd.f32 %v2468_v25, %v2215_v58  ;;  %v2473_v27 = vpop.f32.mrf.mxu3 }
 0x28a   : > { %v2913_v62 = vmax.f32 %v2881_v54, 0.0 }
 0x28b   : > { %v2764_v16 = vpop.f32.mrf.mxu0  ;;  %v3025_v29 = vpop.f32.mrf.mxu1 }
 0x28c   : > { %v2810_v6 = vadd.f32 %v2764_v16, %v2466_v22  ;;  %v3026_v0 = vadd.f32 %v3025_v29, %v4964_v34 }
 0x28e   : > { %v2846_v50 = vmul.f32 %v5299_v13, %v2810_v6  ;;  %v3826_v63 = vpack.c.bf16 %v3026_v0, %v3024_v4 }
 0x28f   : > { %v2217_v30 = vpop.f32.mrf.mxu2 }
 0x290   : > { %v2882_v45 = vadd.f32 %v5316_v24, %v2846_v50  ;;  %3909 = vst [vmem:[%s5434_s21 + $0x10] sm:$0xff] %v3826_v63   ;;  %v2471_v26 = vadd.f32 %v2470_v38, %v2217_v30  ;;  %v2475_v16 = vpop.f32.mrf.mxu3 }
 0x292   : > { %v2914_v5 = vmax.f32 %v2882_v45, 0.0 }
 0x293   : > { %v2767_v36 = vpop.f32.mrf.mxu0  ;;  %v3028_v35 = vpop.f32.mrf.mxu1 }
 0x294   : > { %v2934_v53 = vpack.c.bf16 %v2914_v5, %v2913_v62  ;;  %v2811_v28 = vadd.f32 %v2767_v36, %v2469_v3  ;;  %v3029_v42 = vadd.f32 %v3028_v35, %v5007_v37 }
 0x296   : > { %3661 = vmatmul.msk.bf16.gmra.mxu1 %vm2955_vm3, %v2934_v53  ;;  %v2847_v40 = vmul.f32 %v5299_v13, %v2811_v28 }
 0x297   : > { %v2220_v34 = vpop.f32.mrf.mxu2 }
 0x298   : > { %v2883_v44 = vadd.f32 %v5316_v24, %v2847_v40  ;;  %v2474_v22 = vadd.f32 %v2473_v27, %v2220_v34  ;;  %v2478_v62 = vpop.f32.mrf.mxu3 }
 0x29a   : > { %v2915_v56 = vmax.f32 %v2883_v44, 0.0 }
 0x29b   : > { %v2769_v20 = vpop.f32.mrf.mxu0  ;;  %v3030_v60 = vpop.f32.mrf.mxu1 }
 0x29c   : > { %v2812_v33 = vadd.f32 %v2769_v20, %v2471_v26  ;;  %v3031_v21 = vadd.f32 %v3030_v60, %v5050_v43 }
 0x29e   : > { %v2848_v7 = vmul.f32 %v5299_v13, %v2812_v33  ;;  %v3831_v1 = vpack.c.bf16 %v3031_v21, %v3029_v42 }
 0x29f   : > { %v2222_v52 = vpop.f32.mrf.mxu2 }
 0x2a0   : > { %v2884_v14 = vadd.f32 %v5316_v24, %v2848_v7  ;;  %3910 = vst [vmem:[%s5434_s21 + $0x18] sm:$0xff] %v3831_v1   ;;  %v2476_v29 = vadd.f32 %v2475_v16, %v2222_v52  ;;  %v2480_v26 = vpop.f32.mrf.mxu3 }
 0x2a2   : > { %v2916_v25 = vmax.f32 %v2884_v14, 0.0 }
 0x2a3   : > { %v2772_v47 = vpop.f32.mrf.mxu0  ;;  %v3033_v58 = vpop.f32.mrf.mxu1 }
 0x2a4   : > { %v2935_v15 = vpack.c.bf16 %v2916_v25, %v2915_v56  ;;  %v2813_v37 = vadd.f32 %v2772_v47, %v2474_v22  ;;  %v3034_v54 = vadd.f32 %v3033_v58, %v5078_v10 }
 0x2a6   : > { %3662 = vmatmul.msk.bf16.gmra.mxu1 %vm2955_vm3, %v2935_v15  ;;  %v2849_v4 = vmul.f32 %v5299_v13, %v2813_v37 }
 0x2a7   : > { %v2225_v43 = vpop.f32.mrf.mxu2 }
 0x2a8   : > { %v2885_v38 = vadd.f32 %v5316_v24, %v2849_v4  ;;  %v2479_v34 = vadd.f32 %v2478_v62, %v2225_v43  ;;  %v2483_v22 = vpop.f32.mrf.mxu3 }
 0x2aa   : > { %v2917_v35 = vmax.f32 %v2885_v38, 0.0 }
 0x2ab   : > { %v2774_v6 = vpop.f32.mrf.mxu0  ;;  %v3035_v0 = vpop.f32.mrf.mxu1 }
 0x2ac   : > { %v2814_v50 = vadd.f32 %v2774_v6, %v2476_v29  ;;  %v3036_v63 = vadd.f32 %v3035_v0, %v5118_v9 }
 0x2ae   : > { %v2850_v45 = vmul.f32 %v5299_v13, %v2814_v50  ;;  %v3836_v30 = vpack.c.bf16 %v3036_v63, %v3034_v54 }
 0x2af   : > { %v2227_v36 = vpop.f32.mrf.mxu2 }
 0x2b0   : > { %v2886_v5 = vadd.f32 %v5316_v24, %v2850_v45  ;;  %3911 = vst [vmem:[%s5434_s21 + $0x20] sm:$0xff] %v3836_v30   ;;  %v2481_v40 = vadd.f32 %v2480_v26, %v2227_v36  ;;  %v2485_v4 = vpop.f32.mrf.mxu3 }
 0x2b2   : > { %v2918_v3 = vmax.f32 %v2886_v5, 0.0 }
 0x2b3   : > { %v2777_v53 = vpop.f32.mrf.mxu0  ;;  %v3038_v28 = vpop.f32.mrf.mxu1 }
 0x2b4   : > { %v2936_v27 = vpack.c.bf16 %v2918_v3, %v2917_v35  ;;  %v2815_v10 = vadd.f32 %v2777_v53, %v2479_v34  ;;  %v3039_v33 = vadd.f32 %v3038_v28, %v5134_v2 }
 0x2b6   : > { %3663 = vmatmul.msk.bf16.gmra.mxu1 %vm2955_vm3, %v2936_v27  ;;  %v2851_v20 = vmul.f32 %v5299_v13, %v2815_v10 }
 0x2b7   : > { %v2230_v9 = vpop.f32.mrf.mxu2 }
 0x2b8   : > { %v2887_v7 = vadd.f32 %v5316_v24, %v2851_v20  ;;  %v2484_v16 = vadd.f32 %v2483_v22, %v2230_v9 }
 0x2ba   : > { %v2919_v25 = vmax.f32 %v2887_v7, 0.0 }
 0x2bb   : > { %v2779_v60 = vpop.f32.mrf.mxu0  ;;  %v3040_v42 = vpop.f32.mrf.mxu1 }
 0x2bc   : > { %v2816_v21 = vadd.f32 %v2779_v60, %v2481_v40  ;;  %v3041_v44 = vadd.f32 %v3040_v42, %v5157_v51  ;;  %v5577_v40 = vld [vmem:[#allocation6_spill] sm:$0xff]  ;;  %v5578_v42 = vld [vmem:[#allocation7_spill] sm:$0xff] }
 0x2be   : > { %v2852_v1 = vmul.f32 %v5299_v13, %v2816_v21  ;;  %v3841_v14 = vpack.c.bf16 %v3041_v44, %v3039_v33 }
 0x2bf   : > { %v2232_v56 = vpop.f32.mrf.mxu2 }
 0x2c0   : > { %v2888_v52 = vadd.f32 %v5316_v24, %v2852_v1  ;;  %3912 = vst [vmem:[%s5434_s21 + $0x28] sm:$0xff] %v3841_v14   ;;  %v2486_v0 = vadd.f32 %v2485_v4, %v2232_v56 }
 0x2c2   : > { %v2920_v47 = vmax.f32 %v2888_v52, 0.0 }
 0x2c3   : > { %v3043_v58 = vpop.f32.mrf.mxu1 }
 0x2c4   : > { %v2937_v15 = vpack.c.bf16 %v2920_v47, %v2919_v25  ;;  %v3044_v43 = vadd.f32 %v3043_v58, %v5181_v55 }
 0x2c6   : > { %3664 = vmatmul.msk.bf16.gmra.mxu1 %vm2955_vm3, %v2937_v15 }
 0x2c7   : > { %v2782_v2 = vpop.f32.mrf.mxu2 }
 0x2c8   : > { %v2817_v51 = vadd.f32 %v2782_v2, %v2484_v16 }
 0x2ca   : > { %v2853_v54 = vmul.f32 %v5299_v13, %v2817_v51 }
 0x2cb   : > { %v3045_v37 = vpop.f32.mrf.mxu1 }
 0x2cc   : > { %v3046_v29 = vadd.f32 %v3045_v37, %v5195_v49  ;;  %v2889_v38 = vadd.f32 %v5316_v24, %v2853_v54 }
 0x2ce   : > { %v3846_v6 = vpack.c.bf16 %v3046_v29, %v3044_v43  ;;  %v2921_v55 = vmax.f32 %v2889_v38, 0.0 }
 0x2cf   : > { %v2784_v50 = vpop.f32.mrf.mxu2 }
 0x2d0   : > { %3913 = vst [vmem:[%s5434_s21 + $0x30] sm:$0xff] %v3846_v6   ;;  %v2818_v63 = vadd.f32 %v2784_v50, %v2486_v0 }
 0x2d2   : > { %v2854_v45 = vmul.f32 %v5299_v13, %v2818_v63 }
 0x2d3   : > { %v3048_v30 = vpop.f32.mrf.mxu1 }
 0x2d4   : > { %v2890_v62 = vadd.f32 %v5316_v24, %v2854_v45  ;;  %v3049_v35 = vadd.f32 %v3048_v30, %v5213_v12 }
 0x2d6   : > { %v2922_v5 = vmax.f32 %v2890_v62, 0.0 }
 0x2d8   : > { %v2938_v49 = vpack.c.bf16 %v2922_v5, %v2921_v55 }
 0x2da   : > { %3665 = vmatmul.msk.bf16.gmra.mxu1 %vm2955_vm3, %v2938_v49 }
 0x2db   : > { %v3050_v36 = vpop.f32.mrf.mxu1 }
 0x2dc   : > { %v3051_v3 = vadd.f32 %v3050_v36, %v5239_v61 }
 0x2de   : > { %v3851_v53 = vpack.c.bf16 %v3051_v3, %v3049_v35 }
 0x2e0   : > { %3914 = vst [vmem:[%s5434_s21 + $0x38] sm:$0xff] %v3851_v53  }
 0x2e3   : > { %v3053_v28 = vpop.f32.mrf.mxu1 }
 0x2e4   : > { %v3054_v13 = vadd.f32 %v3053_v28, %v5257_v46 }
 0x2eb   : > { %v3055_v34 = vpop.f32.mrf.mxu1 }
 0x2ec   : > { %v3056_v24 = vadd.f32 %v3055_v34, %v5277_v57 }
 0x2ee   : > { %v3856_v27 = vpack.c.bf16 %v3056_v24, %v3054_v13 }
 0x2f0   : > { %3915 = vst [vmem:[%s5434_s21 + $0x40] sm:$0xff] %v3856_v27  }
 0x2f3   : > { %v3058_v10 = vpop.f32.mrf.mxu1 }
 0x2f4   : > { %v3059_v26 = vadd.f32 %v3058_v10, %v4863_v11 }
 0x2fb   : > { %v3060_v9 = vpop.f32.mrf.mxu1 }
 0x2fc   : > { %v3061_v12 = vadd.f32 %v3060_v9, %v5577_v40 }
 0x2fe   : > { %v3861_v20 = vpack.c.bf16 %v3061_v12, %v3059_v26 }
 0x300   : > { %3916 = vst [vmem:[%s5434_s21 + $0x48] sm:$0xff] %v3861_v20  }
 0x303   : > { %v3063_v61 = vpop.f32.mrf.mxu1 }
 0x304   : > { %v3064_v33 = vadd.f32 %v3063_v61, %v5578_v42 }
 0x30b   : > { %v3065_v60 = vpop.f32.mrf.mxu1 }
 0x30c   : > { %v3066_v46 = vadd.f32 %v3065_v60, %v4999_v41 }
 0x30e   : > { %v3866_v21 = vpack.c.bf16 %v3066_v46, %v3064_v33 }
 0x310   : > { %3917 = vst [vmem:[%s5434_s21 + $0x50] sm:$0xff] %v3866_v21  }
 0x313   : > { %v3068_v57 = vpop.f32.mrf.mxu1 }
 0x314   : > { %v3069_v7 = vadd.f32 %v3068_v57, %v5034_v39 }
 0x31b   : > { %v3070_v44 = vpop.f32.mrf.mxu1 }
 0x31c   : > { %v3071_v11 = vadd.f32 %v3070_v44, %v5074_v59 }
 0x31e   : > { %v3871_v1 = vpack.c.bf16 %v3071_v11, %v3069_v7 }
 0x320   : > { %3918 = vst [vmem:[%s5434_s21 + $0x58] sm:$0xff] %v3871_v1  }
 0x323   : > { %v3073_v14 = vpop.f32.mrf.mxu1 }
 0x324   : > { %v3074_v56 = vadd.f32 %v3073_v14, %v5114_v19 }
 0x32b   : > { %v3075_v52 = vpop.f32.mrf.mxu1 }
 0x32c   : > { %v3076_v25 = vadd.f32 %v3075_v52, %v5130_v8 }
 0x32e   : > { %v3876_v41 = vpack.c.bf16 %v3076_v25, %v3074_v56 }
 0x330   : > { %3919 = vst [vmem:[%s5434_s21 + $0x60] sm:$0xff] %v3876_v41  }
 0x333   : > { %v3078_v47 = vpop.f32.mrf.mxu1 }
 0x334   : > { %v3079_v22 = vadd.f32 %v3078_v47, %v5153_v23 }
 0x33b   : > { %v3080_v58 = vpop.f32.mrf.mxu1 }
 0x33c   : > { %v3081_v39 = vadd.f32 %v3080_v58, %v5177_v48 }
 0x33e   : > { %v3881_v59 = vpack.c.bf16 %v3081_v39, %v3079_v22 }
 0x340   : > { %3920 = vst [vmem:[%s5434_s21 + $0x68] sm:$0xff] %v3881_v59  }
 0x343   : > { %v3083_v15 = vpop.f32.mrf.mxu1 }
 0x344   : > { %v3084_v16 = vadd.f32 %v3083_v15, %v5192_v32 }
 0x34b   : > { %v3085_v2 = vpop.f32.mrf.mxu1 }
 0x34c   : > { %v3086_v19 = vadd.f32 %v3085_v2, %v5211_v18 }
 0x34e   : > { %v3886_v8 = vpack.c.bf16 %v3086_v19, %v3084_v16 }
 0x350   : > { %3921 = vst [vmem:[%s5434_s21 + $0x70] sm:$0xff] %v3886_v8  }
 0x357   : > { %v3088_v51 = vpop.f32.mrf.mxu1 }
 0x358   : > { %v3089_v48 = vadd.f32 %v3088_v51, %v5226_v31 }
 0x35f   : > { %v3090_v23 = vpop.f32.mrf.mxu1 }
 0x360   : > { %v3091_v37 = vadd.f32 %v3090_v23, %v5248_v17 }
 0x362   : > { %v3891_v32 = vpack.c.bf16 %v3091_v37, %v3089_v48 }
 0x364   : > { %3922 = vst [vmem:[%s5434_s21 + $0x78] sm:$0xff] %v3891_v32  }
 0x365   : > { %4015 = shalt.err (!%p4012_p3)
}
 0x366   : > { %s4055_s12 = smov 4   ;;  %s5579_s21 = smov 64  }
 0x367   : > { %3937 = dma.vmem_to_hbm [thread:$0]  (%p4149_p5), %s3171_s30, 2048, %s3173_s29, %s3158_s11, %s5579_s21, %s5579_s21, %s4055_s12  }
 0x368 PF: > { %p3943_p4 = scmp.ge.s32.totalorder %s4050_s16, 2  ;;  %s3187_s25 = sand.u32 1, %s4038_s13  }
 0x369   : > { %s3188_s20 = scalar_lea.sflag [#allocation4], %s3187_s25 }
 0x36a   : > { %p3940_p7 = pnand %p3943_p4, %p4153_p6 }
 0x36c   : > { %p3941_p8 = pneg %p3940_p7 }
 0x36e   : > { %4033 = dma.done.wait (%p3941_p8), %s3188_s20, 2048  }
 0x36f   : > { %4035 = vsyncadd (%p3941_p8), %s3188_s20, 4294965248  ;;  %p20_p9 = scmp.ge.s32.totalorder %s4136_s19, 4   ;;  %s5580_s13 = smov %s4042_s14 }
 0x370   : > { %s5581_s14 = smov %s4046_s15  ;;  %s5582_s15 = smov %s4147_s22 }
 0x371   : > { %s5583_s16 = smov %s4136_s19  ;;  %22 = sbr.rel (!%p20_p9) target bundleno = 3 (0x3), region = 100 }
 0x376   :  { %3194 = vsyncpa [#allocation4], 1 }
 0x377   :  { %3196 = vsyncpa [#allocation4 + $0x1], 1 }

</bundles_post_ra>
